<compile_context>
chip_gen: v6e
topology: v6e:2x2x1
jax: 0.10.0
libtpu: 0.0.40
codegen_flags: <defaults>
</compile_context>

<pallas_src>
import functools

import jax
import jax.numpy as jnp
from jax.experimental import pallas as pl
from jax.experimental.pallas import tpu as pltpu


def rnn_autoencoder_kernel(
    x_ref,                         # (TB, y_in) f32
    we_ref, be_ref,                # embedding Linear: (y_in, E) bf16, (1, E) f32
    wid_ref, bid_ref,              # [enc|dec] input->gates: (E, 8H) bf16, (1, 8H) f32
    wehh_ref,                      # encoder recurrent weight: (H, 4H) bf16
    wdhh_ref,                      # decoder recurrent weight (t=0): (H, 4H) bf16
    wdec_ref, bdec_ref,            # fused decoder recurrence (t>=1): (H, 4H) bf16, (1, 4H) f32
    wp1_ref, bp1_ref,              # out proj 1: (H, E) bf16, (1, E) f32
    wp2_ref, bp2_ref,              # out proj 2: (E, y_in) bf16, (1, y_in) f32
    out_ref,                       # (TB, y_in) f32
    h_scratch,                     # (T*TB, H) f32 VMEM scratch
    *,
    T, H,
):
    f32 = jnp.float32
    bf16 = jnp.bfloat16
    TB = x_ref.shape[0]

    # ---- loop-invariant loads / broadcasts, hoisted off the serial path ----
    wehh = wehh_ref[...]                                   # (H, 4H) bf16
    wdhh = wdhh_ref[...]                                   # (H, 4H) bf16
    wdec = wdec_ref[...]                                   # (H, 4H) bf16
    bdec = jnp.broadcast_to(bdec_ref[...], (TB, 4 * H))    # hoisted broadcast

    # Whole-vreg gate-activation constants: sigmoid(x) = 0.5*tanh(0.5*x) + 0.5
    # on the i/f/o columns, tanh(x) on the g columns -> one EUP pass per step.
    lane = jax.lax.broadcasted_iota(jnp.int32, (TB, 4 * H), 1)
    is_g = (lane >= 2 * H) & (lane < 3 * H)
    act_pre = jnp.where(is_g, 1.0, 0.5).astype(f32)        # pre- and post-mul
    act_add = jnp.where(is_g, 0.0, 0.5).astype(f32)

    def lstm_step(gates, c):
        a = jnp.tanh(gates * act_pre) * act_pre + act_add  # activated [i,f,g,o]
        i = a[:, 0 * H:1 * H]
        f = a[:, 1 * H:2 * H]
        g = a[:, 2 * H:3 * H]
        o = a[:, 3 * H:4 * H]
        c_new = f * c + i * g
        h_new = o * jnp.tanh(c_new)
        return h_new, c_new

    # ---- embedding: Linear + ReLU (Dropout = identity at inference) ----
    x = x_ref[...].astype(bf16)
    emb = jnp.dot(x, we_ref[...], preferred_element_type=f32) + be_ref[...]
    emb = jnp.maximum(emb, 0.0)
    emb_bf = emb.astype(bf16)

    # Time-invariant input->gate contributions for BOTH LSTMs in one matmul;
    # split lands exactly on the 4H (=128 for H=32) lane boundary.
    xg = jnp.dot(emb_bf, wid_ref[...], preferred_element_type=f32) + bid_ref[...]
    xg_enc = xg[:, :4 * H]
    xg_dec0 = xg[:, 4 * H:]

    # ---- encoder LSTM over T identical inputs (1 bf16 matmul / step) ----
    h = jnp.zeros((TB, H), f32)
    c = jnp.zeros((TB, H), f32)
    for _ in range(T):
        gates = xg_enc + jnp.dot(h.astype(bf16), wehh, preferred_element_type=f32)
        h, c = lstm_step(gates, c)

    # ---- decoder LSTM (1 bf16 matmul / step); hidden states -> VMEM scratch ----
    # t = 0: input is the embedded x (precomputed xg_dec0).
    # t >= 1: hidden_to_embedding + input weights folded into wdec / bdec.
    gates = xg_dec0 + jnp.dot(h.astype(bf16), wdhh, preferred_element_type=f32)
    h, c = lstm_step(gates, c)
    h_scratch[0:TB, :] = h
    for t in range(1, T):
        gates = bdec + jnp.dot(h.astype(bf16), wdec, preferred_element_type=f32)
        h, c = lstm_step(gates, c)
        h_scratch[t * TB:(t + 1) * TB, :] = h

    # ---- output projection, hoisted out of the recurrence ----
    h_all = h_scratch[...].astype(bf16)                               # (T*TB, H)
    p1 = jnp.maximum(
        jnp.dot(h_all, wp1_ref[...], preferred_element_type=f32) + bp1_ref[...],
        0.0)                                                          # (T*TB, E)
    # mean over T folded BEFORE the (linear) second projection -> one wp2 matmul
    acc = p1[0:TB, :]
    for t in range(1, T):
        acc = acc + p1[t * TB:(t + 1) * TB, :]
    acc = acc * (1.0 / T)
    out = jnp.dot(acc.astype(bf16), wp2_ref[...], preferred_element_type=f32)
    out_ref[...] = (out + bp2_ref[...]).astype(out_ref.dtype)


def rnn_autoencoder_forward(x, params, *, T, H):
    """x: (B, y_in) float32.  params: dict of pre-transposed weights."""
    B, y_in = x.shape
    bf16 = jnp.bfloat16

    # Host-side algebraic fusion of the decoder input path (t >= 1):
    #   gates_t = (h W_h2e + b_h2e) W_dih + b_d + h W_dhh
    #           = h (W_dhh + W_h2e W_dih) + (b_d + b_h2e W_dih)
    wdec = params["wdhh"] + params["wh2e"] @ params["wdih"]
    bdec = params["bdb"] + params["bh2e"] @ params["wdih"]

    # bf16 weights everywhere (f32 accumulation inside the kernel).
    we = params["we"].astype(bf16)
    wid = jnp.concatenate([params["weih"], params["wdih"]], axis=1).astype(bf16)
    bid = jnp.concatenate([params["beb"], params["bdb"]], axis=1)
    wehh = params["wehh"].astype(bf16)
    wdhh = params["wdhh"].astype(bf16)
    wdec = wdec.astype(bf16)
    wp1 = params["wp1"].astype(bf16)
    wp2 = params["wp2"].astype(bf16)

    # ---- batch tiling: pad B up to a multiple of TB (no grid tail drop) ----
    def rup(a, b):
        return ((a + b - 1) // b) * b

    B8 = rup(max(B, 1), 8)
    if B8 <= 8:
        TB = B8
    else:
        # >= 2 grid blocks so the "parallel" batch axis can shard across the
        # two v7x TensorCores; each extra block costs only ~0.35us on the
        # single-TC v5e/v6e.  Cap block rows at 256 (VMEM is a non-issue).
        nblk = max(2, -(-B8 // 256))
        TB = rup(-(-B8 // nblk), 8)
    B_pad = rup(B8, TB)
    if B_pad != B:
        x = jnp.pad(x, ((0, B_pad - B), (0, 0)))
    grid = (B_pad // TB,)

    inputs = (
        x,
        we, params["be"],
        wid, bid,
        wehh, wdhh,
        wdec, bdec,
        wp1, params["bp1"],
        wp2, params["bp2"],
    )

    def full_spec(arr):
        return pl.BlockSpec(arr.shape, lambda i: (0, 0))

    in_specs = [pl.BlockSpec((TB, y_in), lambda i: (i, 0))]
    in_specs += [full_spec(a) for a in inputs[1:]]

    kernel = functools.partial(rnn_autoencoder_kernel, T=T, H=H)
    out = pl.pallas_call(
        kernel,
        out_shape=jax.ShapeDtypeStruct((B_pad, y_in), jnp.float32),
        grid=grid,
        in_specs=in_specs,
        out_specs=pl.BlockSpec((TB, y_in), lambda i: (i, 0)),
        scratch_shapes=[pltpu.VMEM((T * TB, H), jnp.float32)],
        compiler_params=pltpu.CompilerParams(
            dimension_semantics=("parallel",)),
    )(*inputs)
    return out[:B]


def rnn_autoencoder_ref(x, params, *, T, H):
    """Pure-JAX f32 reference with the original (unfused) PyTorch structure."""
    f32 = jnp.float32
    B = x.shape[0]

    def step(gates, c):
        i = jax.nn.sigmoid(gates[:, :H])
        f = jax.nn.sigmoid(gates[:, H:2 * H])
        g = jnp.tanh(gates[:, 2 * H:3 * H])
        o = jax.nn.sigmoid(gates[:, 3 * H:])
        c = f * c + i * g
        return o * jnp.tanh(c), c

    emb = jnp.maximum(x @ params["we"] + params["be"], 0.0)
    h = jnp.zeros((B, H), f32)
    c = jnp.zeros((B, H), f32)
    for _ in range(T):
        h, c = step(emb @ params["weih"] + params["beb"] + h @ params["wehh"], c)
    d = emb
    outs = []
    for t in range(T):
        h, c = step(d @ params["wdih"] + params["bdb"] + h @ params["wdhh"], c)
        p1 = jnp.maximum(h @ params["wp1"] + params["bp1"], 0.0)
        outs.append(p1 @ params["wp2"] + params["bp2"])
        if t < T - 1:
            d = h @ params["wh2e"] + params["bh2e"]
    return sum(outs) / T


def init_params(key, y_in, hidden, emb):
    """Deterministic synthetic parameters (PyTorch-equivalent shapes),
    pre-transposed to (in_features, out_features) for `x @ W` matmuls.
    LSTM biases (b_ih + b_hh) are folded together."""
    ks = jax.random.split(key, 16)
    s = 0.1

    def mk(k, shape):
        return jax.random.normal(k, shape, jnp.float32) * s

    params = {
        # embedding Linear(y_in -> emb)
        "we": mk(ks[0], (y_in, emb)),
        "be": mk(ks[1], (1, emb)),
        # encoder LSTM
        "weih": mk(ks[2], (emb, 4 * hidden)),
        "wehh": mk(ks[3], (hidden, 4 * hidden)),
        "beb": mk(ks[4], (1, 4 * hidden)) + mk(ks[5], (1, 4 * hidden)),
        # decoder LSTM
        "wdih": mk(ks[6], (emb, 4 * hidden)),
        "wdhh": mk(ks[7], (hidden, 4 * hidden)),
        "bdb": mk(ks[8], (1, 4 * hidden)) + mk(ks[9], (1, 4 * hidden)),
        # output_projection: Linear(hidden->emb), ReLU, Linear(emb->y_in)
        "wp1": mk(ks[10], (hidden, emb)),
        "bp1": mk(ks[11], (1, emb)),
        "wp2": mk(ks[12], (emb, y_in)),
        "bp2": mk(ks[13], (1, y_in)),
        # hidden_to_embedding Linear(hidden -> emb)
        "wh2e": mk(ks[14], (hidden, emb)),
        "bh2e": mk(ks[15], (1, emb)),
    }
    return params


if __name__ == "__main__":
    # Module hyperparameters: y_in, y1 (hidden), y2 (embedding_dim); y3, y4 unused.
    y_in, hidden, emb = 16, 32, 32
    T = min(10, max(5, y_in // 4))  # == 5 for y_in=16
    B = 2

    key = jax.random.PRNGKey(0)
    kx, kp = jax.random.split(key)
    x = jax.random.normal(kx, (B, y_in), jnp.float32)
    params = init_params(kp, y_in, hidden, emb)

    out = rnn_autoencoder_forward(x, params, T=T, H=hidden)
    out = jax.block_until_ready(out)
    assert out.shape == (B, y_in) and out.dtype == jnp.float32
    assert bool(jnp.all(jnp.isfinite(out)))

    # Validate against the unfused f32 reference (all matmuls run in bf16 with
    # f32 accumulation inside the kernel -> loose absolute tolerance).
    ref = rnn_autoencoder_ref(x, params, T=T, H=hidden)
    assert bool(jnp.max(jnp.abs(out - ref)) < 5e-2)

    print("KERNEL_OK")
</pallas_src>

<mosaic_0001>
module attributes {stable_mosaic.version = 11 : i64} {
  func.func @rnn_autoencoder_kernel(%arg0: i32, %arg1: memref<8x16xf32, #tpu.memory_space<vmem>>, %arg2: memref<16x32xbf16, #tpu.memory_space<vmem>>, %arg3: memref<1x32xf32, #tpu.memory_space<vmem>>, %arg4: memref<32x256xbf16, #tpu.memory_space<vmem>>, %arg5: memref<1x256xf32, #tpu.memory_space<vmem>>, %arg6: memref<32x128xbf16, #tpu.memory_space<vmem>>, %arg7: memref<32x128xbf16, #tpu.memory_space<vmem>>, %arg8: memref<32x128xbf16, #tpu.memory_space<vmem>>, %arg9: memref<1x128xf32, #tpu.memory_space<vmem>>, %arg10: memref<32x32xbf16, #tpu.memory_space<vmem>>, %arg11: memref<1x32xf32, #tpu.memory_space<vmem>>, %arg12: memref<32x16xbf16, #tpu.memory_space<vmem>>, %arg13: memref<1x16xf32, #tpu.memory_space<vmem>>, %arg14: memref<8x16xf32, #tpu.memory_space<vmem>>, %arg15: memref<40x32xf32, #tpu.memory_space<vmem>>) attributes {dimension_semantics = [#tpu.dimension_semantics<parallel>], iteration_bounds = array<i64: 1>, scalar_prefetch = 0 : i64, scratch_operands = 1 : i64, tpu.core_type = #tpu.core_type<tc>, window_params = [{transform_indices = @transform_0, window_bounds = array<i64: 8, 16>}, {pipeline_mode = #tpu.pipeline_mode<synchronous>, transform_indices = @transform_1, window_bounds = array<i64: 16, 32>}, {pipeline_mode = #tpu.pipeline_mode<synchronous>, transform_indices = @transform_2, window_bounds = array<i64: 1, 32>}, {pipeline_mode = #tpu.pipeline_mode<synchronous>, transform_indices = @transform_3, window_bounds = array<i64: 32, 256>}, {pipeline_mode = #tpu.pipeline_mode<synchronous>, transform_indices = @transform_4, window_bounds = array<i64: 1, 256>}, {pipeline_mode = #tpu.pipeline_mode<synchronous>, transform_indices = @transform_5, window_bounds = array<i64: 32, 128>}, {pipeline_mode = #tpu.pipeline_mode<synchronous>, transform_indices = @transform_6, window_bounds = array<i64: 32, 128>}, {pipeline_mode = #tpu.pipeline_mode<synchronous>, transform_indices = @transform_7, window_bounds = array<i64: 32, 128>}, {pipeline_mode = #tpu.pipeline_mode<synchronous>, transform_indices = @transform_8, window_bounds = array<i64: 1, 128>}, {pipeline_mode = #tpu.pipeline_mode<synchronous>, transform_indices = @transform_9, window_bounds = array<i64: 32, 32>}, {pipeline_mode = #tpu.pipeline_mode<synchronous>, transform_indices = @transform_10, window_bounds = array<i64: 1, 32>}, {pipeline_mode = #tpu.pipeline_mode<synchronous>, transform_indices = @transform_11, window_bounds = array<i64: 32, 16>}, {pipeline_mode = #tpu.pipeline_mode<synchronous>, transform_indices = @transform_12, window_bounds = array<i64: 1, 16>}, {transform_indices = @transform_13, window_bounds = array<i64: 8, 16>}]} {
    %c0 = arith.constant 0 : index
    %c0_0 = arith.constant 0 : index
    %0 = vector.load %arg6[%c0, %c0_0] : memref<32x128xbf16, #tpu.memory_space<vmem>>, vector<32x128xbf16>
    %c0_1 = arith.constant 0 : index
    %c0_2 = arith.constant 0 : index
    %1 = vector.load %arg7[%c0_1, %c0_2] : memref<32x128xbf16, #tpu.memory_space<vmem>>, vector<32x128xbf16>
    %c0_3 = arith.constant 0 : index
    %c0_4 = arith.constant 0 : index
    %2 = vector.load %arg8[%c0_3, %c0_4] : memref<32x128xbf16, #tpu.memory_space<vmem>>, vector<32x128xbf16>
    %c0_5 = arith.constant 0 : index
    %c0_6 = arith.constant 0 : index
    %3 = vector.load %arg9[%c0_5, %c0_6] : memref<1x128xf32, #tpu.memory_space<vmem>>, vector<1x128xf32>
    %4 = vector.shape_cast %3 : vector<1x128xf32> to vector<1x128xf32>
    %5 = vector.broadcast %4 : vector<1x128xf32> to vector<8x128xf32>
    %6 = tpu.iota {dimensions = array<i32: 1>} : vector<8x128xi32>
    %c64_i32 = arith.constant 64 : i32
    %7 = vector.broadcast %c64_i32 : i32 to vector<8x128xi32>
    %8 = arith.cmpi sge, %6, %7 : vector<8x128xi32>
    %c96_i32 = arith.constant 96 : i32
    %9 = vector.broadcast %c96_i32 : i32 to vector<8x128xi32>
    %10 = arith.cmpi slt, %6, %9 : vector<8x128xi32>
    %11 = arith.andi %8, %10 : vector<8x128xi1>
    %cst = arith.constant 1.000000e+00 : f32
    %cst_7 = arith.constant 5.000000e-01 : f32
    %12 = vector.broadcast %cst : f32 to vector<8x128xf32>
    %13 = vector.broadcast %cst_7 : f32 to vector<8x128xf32>
    %14 = arith.select %11, %12, %13 : vector<8x128xi1>, vector<8x128xf32>
    %cst_8 = arith.constant 0.000000e+00 : f32
    %cst_9 = arith.constant 5.000000e-01 : f32
    %15 = vector.broadcast %cst_8 : f32 to vector<8x128xf32>
    %16 = vector.broadcast %cst_9 : f32 to vector<8x128xf32>
    %17 = arith.select %11, %15, %16 : vector<8x128xi1>, vector<8x128xf32>
    %c0_10 = arith.constant 0 : index
    %c0_11 = arith.constant 0 : index
    %18 = vector.load %arg1[%c0_10, %c0_11] : memref<8x16xf32, #tpu.memory_space<vmem>>, vector<8x16xf32>
    %19 = arith.truncf %18 : vector<8x16xf32> to vector<8x16xbf16>
    %c0_12 = arith.constant 0 : index
    %c0_13 = arith.constant 0 : index
    %20 = vector.load %arg2[%c0_12, %c0_13] : memref<16x32xbf16, #tpu.memory_space<vmem>>, vector<16x32xbf16>
    %cst_14 = arith.constant dense<0.000000e+00> : vector<8x32xf32>
    %21 = tpu.matmul %19, %20, %cst_14 {dimension_numbers = #tpu.dot_dimension_numbers<[1], [0], [0], [1], [0, 0, 1, 1], [], []>} : vector<8x16xbf16>, vector<16x32xbf16>, vector<8x32xf32> -> vector<8x32xf32>
    %c0_15 = arith.constant 0 : index
    %c0_16 = arith.constant 0 : index
    %22 = vector.load %arg3[%c0_15, %c0_16] : memref<1x32xf32, #tpu.memory_space<vmem>>, vector<1x32xf32>
    %23 = vector.broadcast %22 : vector<1x32xf32> to vector<8x32xf32>
    %24 = arith.addf %21, %23 : vector<8x32xf32>
    %cst_17 = arith.constant 0.000000e+00 : f32
    %25 = vector.broadcast %cst_17 : f32 to vector<8x32xf32>
    %26 = arith.maximumf %24, %25 : vector<8x32xf32>
    %27 = arith.truncf %26 : vector<8x32xf32> to vector<8x32xbf16>
    %c0_18 = arith.constant 0 : index
    %c0_19 = arith.constant 0 : index
    %28 = vector.load %arg4[%c0_18, %c0_19] : memref<32x256xbf16, #tpu.memory_space<vmem>>, vector<32x256xbf16>
    %cst_20 = arith.constant dense<0.000000e+00> : vector<8x256xf32>
    %29 = tpu.matmul %27, %28, %cst_20 {dimension_numbers = #tpu.dot_dimension_numbers<[1], [0], [0], [1], [0, 0, 1, 1], [], []>} : vector<8x32xbf16>, vector<32x256xbf16>, vector<8x256xf32> -> vector<8x256xf32>
    %c0_21 = arith.constant 0 : index
    %c0_22 = arith.constant 0 : index
    %30 = vector.load %arg5[%c0_21, %c0_22] : memref<1x256xf32, #tpu.memory_space<vmem>>, vector<1x256xf32>
    %31 = vector.broadcast %30 : vector<1x256xf32> to vector<8x256xf32>
    %32 = arith.addf %29, %31 : vector<8x256xf32>
    %33 = vector.extract_strided_slice %32 {offsets = [0, 0], sizes = [8, 128], strides = [1, 1]} : vector<8x256xf32> to vector<8x128xf32>
    %34 = vector.extract_strided_slice %32 {offsets = [0, 128], sizes = [8, 128], strides = [1, 1]} : vector<8x256xf32> to vector<8x128xf32>
    %cst_23 = arith.constant 0.000000e+00 : f32
    %35 = vector.broadcast %cst_23 : f32 to vector<8x32xf32>
    %cst_24 = arith.constant 0.000000e+00 : f32
    %36 = vector.broadcast %cst_24 : f32 to vector<8x32xf32>
    %37 = arith.truncf %35 : vector<8x32xf32> to vector<8x32xbf16>
    %cst_25 = arith.constant dense<0.000000e+00> : vector<8x128xf32>
    %38 = tpu.matmul %37, %0, %cst_25 {dimension_numbers = #tpu.dot_dimension_numbers<[1], [0], [0], [1], [0, 0, 1, 1], [], []>} : vector<8x32xbf16>, vector<32x128xbf16>, vector<8x128xf32> -> vector<8x128xf32>
    %39 = arith.addf %33, %38 : vector<8x128xf32>
    %40 = arith.mulf %39, %14 : vector<8x128xf32>
    %41 = math.tanh %40 : vector<8x128xf32>
    %42 = arith.mulf %41, %14 : vector<8x128xf32>
    %43 = arith.addf %42, %17 : vector<8x128xf32>
    %44 = vector.extract_strided_slice %43 {offsets = [0, 0], sizes = [8, 32], strides = [1, 1]} : vector<8x128xf32> to vector<8x32xf32>
    %45 = vector.extract_strided_slice %43 {offsets = [0, 32], sizes = [8, 32], strides = [1, 1]} : vector<8x128xf32> to vector<8x32xf32>
    %46 = vector.extract_strided_slice %43 {offsets = [0, 64], sizes = [8, 32], strides = [1, 1]} : vector<8x128xf32> to vector<8x32xf32>
    %47 = vector.extract_strided_slice %43 {offsets = [0, 96], sizes = [8, 32], strides = [1, 1]} : vector<8x128xf32> to vector<8x32xf32>
    %48 = arith.mulf %45, %36 : vector<8x32xf32>
    %49 = arith.mulf %44, %46 : vector<8x32xf32>
    %50 = arith.addf %48, %49 : vector<8x32xf32>
    %51 = math.tanh %50 : vector<8x32xf32>
    %52 = arith.mulf %47, %51 : vector<8x32xf32>
    %53 = arith.truncf %52 : vector<8x32xf32> to vector<8x32xbf16>
    %cst_26 = arith.constant dense<0.000000e+00> : vector<8x128xf32>
    %54 = tpu.matmul %53, %0, %cst_26 {dimension_numbers = #tpu.dot_dimension_numbers<[1], [0], [0], [1], [0, 0, 1, 1], [], []>} : vector<8x32xbf16>, vector<32x128xbf16>, vector<8x128xf32> -> vector<8x128xf32>
    %55 = arith.addf %33, %54 : vector<8x128xf32>
    %56 = arith.mulf %55, %14 : vector<8x128xf32>
    %57 = math.tanh %56 : vector<8x128xf32>
    %58 = arith.mulf %57, %14 : vector<8x128xf32>
    %59 = arith.addf %58, %17 : vector<8x128xf32>
    %60 = vector.extract_strided_slice %59 {offsets = [0, 0], sizes = [8, 32], strides = [1, 1]} : vector<8x128xf32> to vector<8x32xf32>
    %61 = vector.extract_strided_slice %59 {offsets = [0, 32], sizes = [8, 32], strides = [1, 1]} : vector<8x128xf32> to vector<8x32xf32>
    %62 = vector.extract_strided_slice %59 {offsets = [0, 64], sizes = [8, 32], strides = [1, 1]} : vector<8x128xf32> to vector<8x32xf32>
    %63 = vector.extract_strided_slice %59 {offsets = [0, 96], sizes = [8, 32], strides = [1, 1]} : vector<8x128xf32> to vector<8x32xf32>
    %64 = arith.mulf %61, %50 : vector<8x32xf32>
    %65 = arith.mulf %60, %62 : vector<8x32xf32>
    %66 = arith.addf %64, %65 : vector<8x32xf32>
    %67 = math.tanh %66 : vector<8x32xf32>
    %68 = arith.mulf %63, %67 : vector<8x32xf32>
    %69 = arith.truncf %68 : vector<8x32xf32> to vector<8x32xbf16>
    %cst_27 = arith.constant dense<0.000000e+00> : vector<8x128xf32>
    %70 = tpu.matmul %69, %0, %cst_27 {dimension_numbers = #tpu.dot_dimension_numbers<[1], [0], [0], [1], [0, 0, 1, 1], [], []>} : vector<8x32xbf16>, vector<32x128xbf16>, vector<8x128xf32> -> vector<8x128xf32>
    %71 = arith.addf %33, %70 : vector<8x128xf32>
    %72 = arith.mulf %71, %14 : vector<8x128xf32>
    %73 = math.tanh %72 : vector<8x128xf32>
    %74 = arith.mulf %73, %14 : vector<8x128xf32>
    %75 = arith.addf %74, %17 : vector<8x128xf32>
    %76 = vector.extract_strided_slice %75 {offsets = [0, 0], sizes = [8, 32], strides = [1, 1]} : vector<8x128xf32> to vector<8x32xf32>
    %77 = vector.extract_strided_slice %75 {offsets = [0, 32], sizes = [8, 32], strides = [1, 1]} : vector<8x128xf32> to vector<8x32xf32>
    %78 = vector.extract_strided_slice %75 {offsets = [0, 64], sizes = [8, 32], strides = [1, 1]} : vector<8x128xf32> to vector<8x32xf32>
    %79 = vector.extract_strided_slice %75 {offsets = [0, 96], sizes = [8, 32], strides = [1, 1]} : vector<8x128xf32> to vector<8x32xf32>
    %80 = arith.mulf %77, %66 : vector<8x32xf32>
    %81 = arith.mulf %76, %78 : vector<8x32xf32>
    %82 = arith.addf %80, %81 : vector<8x32xf32>
    %83 = math.tanh %82 : vector<8x32xf32>
    %84 = arith.mulf %79, %83 : vector<8x32xf32>
    %85 = arith.truncf %84 : vector<8x32xf32> to vector<8x32xbf16>
    %cst_28 = arith.constant dense<0.000000e+00> : vector<8x128xf32>
    %86 = tpu.matmul %85, %0, %cst_28 {dimension_numbers = #tpu.dot_dimension_numbers<[1], [0], [0], [1], [0, 0, 1, 1], [], []>} : vector<8x32xbf16>, vector<32x128xbf16>, vector<8x128xf32> -> vector<8x128xf32>
    %87 = arith.addf %33, %86 : vector<8x128xf32>
    %88 = arith.mulf %87, %14 : vector<8x128xf32>
    %89 = math.tanh %88 : vector<8x128xf32>
    %90 = arith.mulf %89, %14 : vector<8x128xf32>
    %91 = arith.addf %90, %17 : vector<8x128xf32>
    %92 = vector.extract_strided_slice %91 {offsets = [0, 0], sizes = [8, 32], strides = [1, 1]} : vector<8x128xf32> to vector<8x32xf32>
    %93 = vector.extract_strided_slice %91 {offsets = [0, 32], sizes = [8, 32], strides = [1, 1]} : vector<8x128xf32> to vector<8x32xf32>
    %94 = vector.extract_strided_slice %91 {offsets = [0, 64], sizes = [8, 32], strides = [1, 1]} : vector<8x128xf32> to vector<8x32xf32>
    %95 = vector.extract_strided_slice %91 {offsets = [0, 96], sizes = [8, 32], strides = [1, 1]} : vector<8x128xf32> to vector<8x32xf32>
    %96 = arith.mulf %93, %82 : vector<8x32xf32>
    %97 = arith.mulf %92, %94 : vector<8x32xf32>
    %98 = arith.addf %96, %97 : vector<8x32xf32>
    %99 = math.tanh %98 : vector<8x32xf32>
    %100 = arith.mulf %95, %99 : vector<8x32xf32>
    %101 = arith.truncf %100 : vector<8x32xf32> to vector<8x32xbf16>
    %cst_29 = arith.constant dense<0.000000e+00> : vector<8x128xf32>
    %102 = tpu.matmul %101, %0, %cst_29 {dimension_numbers = #tpu.dot_dimension_numbers<[1], [0], [0], [1], [0, 0, 1, 1], [], []>} : vector<8x32xbf16>, vector<32x128xbf16>, vector<8x128xf32> -> vector<8x128xf32>
    %103 = arith.addf %33, %102 : vector<8x128xf32>
    %104 = arith.mulf %103, %14 : vector<8x128xf32>
    %105 = math.tanh %104 : vector<8x128xf32>
    %106 = arith.mulf %105, %14 : vector<8x128xf32>
    %107 = arith.addf %106, %17 : vector<8x128xf32>
    %108 = vector.extract_strided_slice %107 {offsets = [0, 0], sizes = [8, 32], strides = [1, 1]} : vector<8x128xf32> to vector<8x32xf32>
    %109 = vector.extract_strided_slice %107 {offsets = [0, 32], sizes = [8, 32], strides = [1, 1]} : vector<8x128xf32> to vector<8x32xf32>
    %110 = vector.extract_strided_slice %107 {offsets = [0, 64], sizes = [8, 32], strides = [1, 1]} : vector<8x128xf32> to vector<8x32xf32>
    %111 = vector.extract_strided_slice %107 {offsets = [0, 96], sizes = [8, 32], strides = [1, 1]} : vector<8x128xf32> to vector<8x32xf32>
    %112 = arith.mulf %109, %98 : vector<8x32xf32>
    %113 = arith.mulf %108, %110 : vector<8x32xf32>
    %114 = arith.addf %112, %113 : vector<8x32xf32>
    %115 = math.tanh %114 : vector<8x32xf32>
    %116 = arith.mulf %111, %115 : vector<8x32xf32>
    %117 = arith.truncf %116 : vector<8x32xf32> to vector<8x32xbf16>
    %cst_30 = arith.constant dense<0.000000e+00> : vector<8x128xf32>
    %118 = tpu.matmul %117, %1, %cst_30 {dimension_numbers = #tpu.dot_dimension_numbers<[1], [0], [0], [1], [0, 0, 1, 1], [], []>} : vector<8x32xbf16>, vector<32x128xbf16>, vector<8x128xf32> -> vector<8x128xf32>
    %119 = arith.addf %34, %118 : vector<8x128xf32>
    %120 = arith.mulf %119, %14 : vector<8x128xf32>
    %121 = math.tanh %120 : vector<8x128xf32>
    %122 = arith.mulf %121, %14 : vector<8x128xf32>
    %123 = arith.addf %122, %17 : vector<8x128xf32>
    %124 = vector.extract_strided_slice %123 {offsets = [0, 0], sizes = [8, 32], strides = [1, 1]} : vector<8x128xf32> to vector<8x32xf32>
    %125 = vector.extract_strided_slice %123 {offsets = [0, 32], sizes = [8, 32], strides = [1, 1]} : vector<8x128xf32> to vector<8x32xf32>
    %126 = vector.extract_strided_slice %123 {offsets = [0, 64], sizes = [8, 32], strides = [1, 1]} : vector<8x128xf32> to vector<8x32xf32>
    %127 = vector.extract_strided_slice %123 {offsets = [0, 96], sizes = [8, 32], strides = [1, 1]} : vector<8x128xf32> to vector<8x32xf32>
    %128 = arith.mulf %125, %114 : vector<8x32xf32>
    %129 = arith.mulf %124, %126 : vector<8x32xf32>
    %130 = arith.addf %128, %129 : vector<8x32xf32>
    %131 = math.tanh %130 : vector<8x32xf32>
    %132 = arith.mulf %127, %131 : vector<8x32xf32>
    %c0_31 = arith.constant 0 : index
    %c0_32 = arith.constant 0 : index
    %133 = vector.load %arg15[%c0_31, %c0_32] : memref<40x32xf32, #tpu.memory_space<vmem>>, vector<8x32xf32>
    tpu.vector_store %arg15[%c0_31, %c0_32], %132 {strides = array<i32>} : memref<40x32xf32, #tpu.memory_space<vmem>>, vector<8x32xf32>,
    %134 = arith.truncf %132 : vector<8x32xf32> to vector<8x32xbf16>
    %cst_33 = arith.constant dense<0.000000e+00> : vector<8x128xf32>
    %135 = tpu.matmul %134, %2, %cst_33 {dimension_numbers = #tpu.dot_dimension_numbers<[1], [0], [0], [1], [0, 0, 1, 1], [], []>} : vector<8x32xbf16>, vector<32x128xbf16>, vector<8x128xf32> -> vector<8x128xf32>
    %136 = arith.addf %5, %135 : vector<8x128xf32>
    %137 = arith.mulf %136, %14 : vector<8x128xf32>
    %138 = math.tanh %137 : vector<8x128xf32>
    %139 = arith.mulf %138, %14 : vector<8x128xf32>
    %140 = arith.addf %139, %17 : vector<8x128xf32>
    %141 = vector.extract_strided_slice %140 {offsets = [0, 0], sizes = [8, 32], strides = [1, 1]} : vector<8x128xf32> to vector<8x32xf32>
    %142 = vector.extract_strided_slice %140 {offsets = [0, 32], sizes = [8, 32], strides = [1, 1]} : vector<8x128xf32> to vector<8x32xf32>
    %143 = vector.extract_strided_slice %140 {offsets = [0, 64], sizes = [8, 32], strides = [1, 1]} : vector<8x128xf32> to vector<8x32xf32>
    %144 = vector.extract_strided_slice %140 {offsets = [0, 96], sizes = [8, 32], strides = [1, 1]} : vector<8x128xf32> to vector<8x32xf32>
    %145 = arith.mulf %142, %130 : vector<8x32xf32>
    %146 = arith.mulf %141, %143 : vector<8x32xf32>
    %147 = arith.addf %145, %146 : vector<8x32xf32>
    %148 = math.tanh %147 : vector<8x32xf32>
    %149 = arith.mulf %144, %148 : vector<8x32xf32>
    %c8 = arith.constant 8 : index
    %c0_34 = arith.constant 0 : index
    %150 = vector.load %arg15[%c8, %c0_34] : memref<40x32xf32, #tpu.memory_space<vmem>>, vector<8x32xf32>
    tpu.vector_store %arg15[%c8, %c0_34], %149 {strides = array<i32>} : memref<40x32xf32, #tpu.memory_space<vmem>>, vector<8x32xf32>,
    %151 = arith.truncf %149 : vector<8x32xf32> to vector<8x32xbf16>
    %cst_35 = arith.constant dense<0.000000e+00> : vector<8x128xf32>
    %152 = tpu.matmul %151, %2, %cst_35 {dimension_numbers = #tpu.dot_dimension_numbers<[1], [0], [0], [1], [0, 0, 1, 1], [], []>} : vector<8x32xbf16>, vector<32x128xbf16>, vector<8x128xf32> -> vector<8x128xf32>
    %153 = arith.addf %5, %152 : vector<8x128xf32>
    %154 = arith.mulf %153, %14 : vector<8x128xf32>
    %155 = math.tanh %154 : vector<8x128xf32>
    %156 = arith.mulf %155, %14 : vector<8x128xf32>
    %157 = arith.addf %156, %17 : vector<8x128xf32>
    %158 = vector.extract_strided_slice %157 {offsets = [0, 0], sizes = [8, 32], strides = [1, 1]} : vector<8x128xf32> to vector<8x32xf32>
    %159 = vector.extract_strided_slice %157 {offsets = [0, 32], sizes = [8, 32], strides = [1, 1]} : vector<8x128xf32> to vector<8x32xf32>
    %160 = vector.extract_strided_slice %157 {offsets = [0, 64], sizes = [8, 32], strides = [1, 1]} : vector<8x128xf32> to vector<8x32xf32>
    %161 = vector.extract_strided_slice %157 {offsets = [0, 96], sizes = [8, 32], strides = [1, 1]} : vector<8x128xf32> to vector<8x32xf32>
    %162 = arith.mulf %159, %147 : vector<8x32xf32>
    %163 = arith.mulf %158, %160 : vector<8x32xf32>
    %164 = arith.addf %162, %163 : vector<8x32xf32>
    %165 = math.tanh %164 : vector<8x32xf32>
    %166 = arith.mulf %161, %165 : vector<8x32xf32>
    %c16 = arith.constant 16 : index
    %c0_36 = arith.constant 0 : index
    %167 = vector.load %arg15[%c16, %c0_36] : memref<40x32xf32, #tpu.memory_space<vmem>>, vector<8x32xf32>
    tpu.vector_store %arg15[%c16, %c0_36], %166 {strides = array<i32>} : memref<40x32xf32, #tpu.memory_space<vmem>>, vector<8x32xf32>,
    %168 = arith.truncf %166 : vector<8x32xf32> to vector<8x32xbf16>
    %cst_37 = arith.constant dense<0.000000e+00> : vector<8x128xf32>
    %169 = tpu.matmul %168, %2, %cst_37 {dimension_numbers = #tpu.dot_dimension_numbers<[1], [0], [0], [1], [0, 0, 1, 1], [], []>} : vector<8x32xbf16>, vector<32x128xbf16>, vector<8x128xf32> -> vector<8x128xf32>
    %170 = arith.addf %5, %169 : vector<8x128xf32>
    %171 = arith.mulf %170, %14 : vector<8x128xf32>
    %172 = math.tanh %171 : vector<8x128xf32>
    %173 = arith.mulf %172, %14 : vector<8x128xf32>
    %174 = arith.addf %173, %17 : vector<8x128xf32>
    %175 = vector.extract_strided_slice %174 {offsets = [0, 0], sizes = [8, 32], strides = [1, 1]} : vector<8x128xf32> to vector<8x32xf32>
    %176 = vector.extract_strided_slice %174 {offsets = [0, 32], sizes = [8, 32], strides = [1, 1]} : vector<8x128xf32> to vector<8x32xf32>
    %177 = vector.extract_strided_slice %174 {offsets = [0, 64], sizes = [8, 32], strides = [1, 1]} : vector<8x128xf32> to vector<8x32xf32>
    %178 = vector.extract_strided_slice %174 {offsets = [0, 96], sizes = [8, 32], strides = [1, 1]} : vector<8x128xf32> to vector<8x32xf32>
    %179 = arith.mulf %176, %164 : vector<8x32xf32>
    %180 = arith.mulf %175, %177 : vector<8x32xf32>
    %181 = arith.addf %179, %180 : vector<8x32xf32>
    %182 = math.tanh %181 : vector<8x32xf32>
    %183 = arith.mulf %178, %182 : vector<8x32xf32>
    %c24 = arith.constant 24 : index
    %c0_38 = arith.constant 0 : index
    %184 = vector.load %arg15[%c24, %c0_38] : memref<40x32xf32, #tpu.memory_space<vmem>>, vector<8x32xf32>
    tpu.vector_store %arg15[%c24, %c0_38], %183 {strides = array<i32>} : memref<40x32xf32, #tpu.memory_space<vmem>>, vector<8x32xf32>,
    %185 = arith.truncf %183 : vector<8x32xf32> to vector<8x32xbf16>
    %cst_39 = arith.constant dense<0.000000e+00> : vector<8x128xf32>
    %186 = tpu.matmul %185, %2, %cst_39 {dimension_numbers = #tpu.dot_dimension_numbers<[1], [0], [0], [1], [0, 0, 1, 1], [], []>} : vector<8x32xbf16>, vector<32x128xbf16>, vector<8x128xf32> -> vector<8x128xf32>
    %187 = arith.addf %5, %186 : vector<8x128xf32>
    %188 = arith.mulf %187, %14 : vector<8x128xf32>
    %189 = math.tanh %188 : vector<8x128xf32>
    %190 = arith.mulf %189, %14 : vector<8x128xf32>
    %191 = arith.addf %190, %17 : vector<8x128xf32>
    %192 = vector.extract_strided_slice %191 {offsets = [0, 0], sizes = [8, 32], strides = [1, 1]} : vector<8x128xf32> to vector<8x32xf32>
    %193 = vector.extract_strided_slice %191 {offsets = [0, 32], sizes = [8, 32], strides = [1, 1]} : vector<8x128xf32> to vector<8x32xf32>
    %194 = vector.extract_strided_slice %191 {offsets = [0, 64], sizes = [8, 32], strides = [1, 1]} : vector<8x128xf32> to vector<8x32xf32>
    %195 = vector.extract_strided_slice %191 {offsets = [0, 96], sizes = [8, 32], strides = [1, 1]} : vector<8x128xf32> to vector<8x32xf32>
    %196 = arith.mulf %193, %181 : vector<8x32xf32>
    %197 = arith.mulf %192, %194 : vector<8x32xf32>
    %198 = arith.addf %196, %197 : vector<8x32xf32>
    %199 = math.tanh %198 : vector<8x32xf32>
    %200 = arith.mulf %195, %199 : vector<8x32xf32>
    %c32 = arith.constant 32 : index
    %c0_40 = arith.constant 0 : index
    %201 = vector.load %arg15[%c32, %c0_40] : memref<40x32xf32, #tpu.memory_space<vmem>>, vector<8x32xf32>
    tpu.vector_store %arg15[%c32, %c0_40], %200 {strides = array<i32>} : memref<40x32xf32, #tpu.memory_space<vmem>>, vector<8x32xf32>,
    %c0_41 = arith.constant 0 : index
    %c0_42 = arith.constant 0 : index
    %202 = vector.load %arg15[%c0_41, %c0_42] : memref<40x32xf32, #tpu.memory_space<vmem>>, vector<40x32xf32>
    %203 = arith.truncf %202 : vector<40x32xf32> to vector<40x32xbf16>
    %c0_43 = arith.constant 0 : index
    %c0_44 = arith.constant 0 : index
    %204 = vector.load %arg10[%c0_43, %c0_44] : memref<32x32xbf16, #tpu.memory_space<vmem>>, vector<32x32xbf16>
    %cst_45 = arith.constant dense<0.000000e+00> : vector<40x32xf32>
    %205 = tpu.matmul %203, %204, %cst_45 {dimension_numbers = #tpu.dot_dimension_numbers<[1], [0], [0], [1], [0, 0, 1, 1], [], []>} : vector<40x32xbf16>, vector<32x32xbf16>, vector<40x32xf32> -> vector<40x32xf32>
    %c0_46 = arith.constant 0 : index
    %c0_47 = arith.constant 0 : index
    %206 = vector.load %arg11[%c0_46, %c0_47] : memref<1x32xf32, #tpu.memory_space<vmem>>, vector<1x32xf32>
    %207 = vector.broadcast %206 : vector<1x32xf32> to vector<40x32xf32>
    %208 = arith.addf %205, %207 : vector<40x32xf32>
    %cst_48 = arith.constant 0.000000e+00 : f32
    %209 = vector.broadcast %cst_48 : f32 to vector<40x32xf32>
    %210 = arith.maximumf %208, %209 : vector<40x32xf32>
    %211 = vector.extract_strided_slice %210 {offsets = [0, 0], sizes = [8, 32], strides = [1, 1]} : vector<40x32xf32> to vector<8x32xf32>
    %212 = vector.extract_strided_slice %210 {offsets = [8, 0], sizes = [8, 32], strides = [1, 1]} : vector<40x32xf32> to vector<8x32xf32>
    %213 = arith.addf %211, %212 : vector<8x32xf32>
    %214 = vector.extract_strided_slice %210 {offsets = [16, 0], sizes = [8, 32], strides = [1, 1]} : vector<40x32xf32> to vector<8x32xf32>
    %215 = arith.addf %213, %214 : vector<8x32xf32>
    %216 = vector.extract_strided_slice %210 {offsets = [24, 0], sizes = [8, 32], strides = [1, 1]} : vector<40x32xf32> to vector<8x32xf32>
    %217 = arith.addf %215, %216 : vector<8x32xf32>
    %218 = vector.extract_strided_slice %210 {offsets = [32, 0], sizes = [8, 32], strides = [1, 1]} : vector<40x32xf32> to vector<8x32xf32>
    %219 = arith.addf %217, %218 : vector<8x32xf32>
    %cst_49 = arith.constant 2.000000e-01 : f32
    %220 = vector.broadcast %cst_49 : f32 to vector<8x32xf32>
    %221 = arith.mulf %219, %220 : vector<8x32xf32>
    %222 = arith.truncf %221 : vector<8x32xf32> to vector<8x32xbf16>
    %c0_50 = arith.constant 0 : index
    %c0_51 = arith.constant 0 : index
    %223 = vector.load %arg12[%c0_50, %c0_51] : memref<32x16xbf16, #tpu.memory_space<vmem>>, vector<32x16xbf16>
    %cst_52 = arith.constant dense<0.000000e+00> : vector<8x16xf32>
    %224 = tpu.matmul %222, %223, %cst_52 {dimension_numbers = #tpu.dot_dimension_numbers<[1], [0], [0], [1], [0, 0, 1, 1], [], []>} : vector<8x32xbf16>, vector<32x16xbf16>, vector<8x16xf32> -> vector<8x16xf32>
    %c0_53 = arith.constant 0 : index
    %c0_54 = arith.constant 0 : index
    %225 = vector.load %arg13[%c0_53, %c0_54] : memref<1x16xf32, #tpu.memory_space<vmem>>, vector<1x16xf32>
    %226 = vector.broadcast %225 : vector<1x16xf32> to vector<8x16xf32>
    %227 = arith.addf %224, %226 : vector<8x16xf32>
    %c0_55 = arith.constant 0 : index
    %c0_56 = arith.constant 0 : index
    %228 = vector.load %arg14[%c0_55, %c0_56] : memref<8x16xf32, #tpu.memory_space<vmem>>, vector<8x16xf32>
    tpu.vector_store %arg14[%c0_55, %c0_56], %227 {strides = array<i32>} : memref<8x16xf32, #tpu.memory_space<vmem>>, vector<8x16xf32>,
    return
  }
  func.func @transform_0(%arg0: i32) -> (i32, i32) {
    %c0_i32 = arith.constant 0 : i32
    %c0_i32_0 = arith.constant 0 : i32
    return %arg0, %c0_i32 : i32, i32
  }
  func.func @transform_1(%arg0: i32) -> (i32, i32) {
    %c0_i32 = arith.constant 0 : i32
    %c0_i32_0 = arith.constant 0 : i32
    %c0_i32_1 = arith.constant 0 : i32
    return %c0_i32, %c0_i32_0 : i32, i32
  }
  func.func @transform_2(%arg0: i32) -> (i32, i32) {
    %c0_i32 = arith.constant 0 : i32
    %c0_i32_0 = arith.constant 0 : i32
    %c0_i32_1 = arith.constant 0 : i32
    return %c0_i32, %c0_i32_0 : i32, i32
  }
  func.func @transform_3(%arg0: i32) -> (i32, i32) {
    %c0_i32 = arith.constant 0 : i32
    %c0_i32_0 = arith.constant 0 : i32
    %c0_i32_1 = arith.constant 0 : i32
    return %c0_i32, %c0_i32_0 : i32, i32
  }
  func.func @transform_4(%arg0: i32) -> (i32, i32) {
    %c0_i32 = arith.constant 0 : i32
    %c0_i32_0 = arith.constant 0 : i32
    %c0_i32_1 = arith.constant 0 : i32
    return %c0_i32, %c0_i32_0 : i32, i32
  }
  func.func @transform_5(%arg0: i32) -> (i32, i32) {
    %c0_i32 = arith.constant 0 : i32
    %c0_i32_0 = arith.constant 0 : i32
    %c0_i32_1 = arith.constant 0 : i32
    return %c0_i32, %c0_i32_0 : i32, i32
  }
  func.func @transform_6(%arg0: i32) -> (i32, i32) {
    %c0_i32 = arith.constant 0 : i32
    %c0_i32_0 = arith.constant 0 : i32
    %c0_i32_1 = arith.constant 0 : i32
    return %c0_i32, %c0_i32_0 : i32, i32
  }
  func.func @transform_7(%arg0: i32) -> (i32, i32) {
    %c0_i32 = arith.constant 0 : i32
    %c0_i32_0 = arith.constant 0 : i32
    %c0_i32_1 = arith.constant 0 : i32
    return %c0_i32, %c0_i32_0 : i32, i32
  }
  func.func @transform_8(%arg0: i32) -> (i32, i32) {
    %c0_i32 = arith.constant 0 : i32
    %c0_i32_0 = arith.constant 0 : i32
    %c0_i32_1 = arith.constant 0 : i32
    return %c0_i32, %c0_i32_0 : i32, i32
  }
  func.func @transform_9(%arg0: i32) -> (i32, i32) {
    %c0_i32 = arith.constant 0 : i32
    %c0_i32_0 = arith.constant 0 : i32
    %c0_i32_1 = arith.constant 0 : i32
    return %c0_i32, %c0_i32_0 : i32, i32
  }
  func.func @transform_10(%arg0: i32) -> (i32, i32) {
    %c0_i32 = arith.constant 0 : i32
    %c0_i32_0 = arith.constant 0 : i32
    %c0_i32_1 = arith.constant 0 : i32
    return %c0_i32, %c0_i32_0 : i32, i32
  }
  func.func @transform_11(%arg0: i32) -> (i32, i32) {
    %c0_i32 = arith.constant 0 : i32
    %c0_i32_0 = arith.constant 0 : i32
    %c0_i32_1 = arith.constant 0 : i32
    return %c0_i32, %c0_i32_0 : i32, i32
  }
  func.func @transform_12(%arg0: i32) -> (i32, i32) {
    %c0_i32 = arith.constant 0 : i32
    %c0_i32_0 = arith.constant 0 : i32
    %c0_i32_1 = arith.constant 0 : i32
    return %c0_i32, %c0_i32_0 : i32, i32
  }
  func.func @transform_13(%arg0: i32) -> (i32, i32) {
    %c0_i32 = arith.constant 0 : i32
    %c0_i32_0 = arith.constant 0 : i32
    return %arg0, %c0_i32 : i32, i32
  }
}

</mosaic_0001>

<bundles_post_ra>
// kernel: tpu_custom_call.1
= control target key start
LH: loop header
LB: loop body
LE: loop exit
PB: predicated region body
PF: predicated region fallthrough
CT: control target
= control target key end

     0   :  { %18 = vsyncpa [#allocation4], 0  ;;  %s2058_s0 = inlined_call_operand.hbm [shape: f32[8,16], index: 0, kind: input, shape index: {}]   ;;  %s2059_s1 = inlined_call_operand.hbm [shape: bf16[16,32], index: 1, kind: input, shape index: {}]   ;;  %s2060_s2 = inlined_call_operand.hbm [shape: f32[1,32], index: 2, kind: input, shape index: {}]   ;;  %s2061_s3 = inlined_call_operand.hbm [shape: bf16[32,256], index: 3, kind: input, shape index: {}]   ;;  %s2062_s4 = inlined_call_operand.hbm [shape: f32[1,256], index: 4, kind: input, shape index: {}]   ;;  %s2063_s5 = inlined_call_operand.vmem [shape: bf16[32,128], index: 5, kind: input, shape index: {}]   ;;  %s2064_s6 = inlined_call_operand.vmem [shape: bf16[32,128], index: 6, kind: input, shape index: {}]   ;;  %s2065_s7 = inlined_call_operand.hbm [shape: bf16[32,128], index: 7, kind: input, shape index: {}]   ;;  %s2066_s8 = inlined_call_operand.hbm [shape: f32[1,128], index: 8, kind: input, shape index: {}]   ;;  %s2067_s9 = inlined_call_operand.hbm [shape: bf16[32,32], index: 9, kind: input, shape index: {}]   ;;  %s2068_s10 = inlined_call_operand.vmem [shape: f32[1,32], index: 10, kind: input, shape index: {}]   ;;  %s2069_s11 = inlined_call_operand.vmem [shape: bf16[32,16], index: 11, kind: input, shape index: {}]   ;;  %s2070_s12 = inlined_call_operand.vmem [shape: f32[1,16], index: 12, kind: input, shape index: {}]   ;;  %s2071_s13 = inlined_call_operand.hbm [shape: f32[8,16], index: 13, kind: output, shape index: {}]  }
   0x1   :  { %19 = vsyncpa [#allocation7], 0 }
   0x2   :  { %20 = vsyncpa [#allocation10], 0 }
   0x3   :  { %21 = vsyncpa [#allocation13], 0 }
   0x4   :  { %22 = vsyncpa [#allocation16], 0 }
   0x5   :  { %23 = vsyncpa [#allocation5], 0  ;;  %s1708_s25 = smov [#allocation6]  }
   0x6   :  { %s39_s26 = sshll.u32 %s1708_s25, 4  ;;  %s40_s26 = int_to_ptr.vmem [resolvable:$true] %s39_s26 }
   0x7   :  { %s1524_s27 = scalar_lea.vmem %s40_s26, 128  ;;  %p1529_p1 = scmp.lt.s32.totalorder %s40_s26, %s40_s26 }
   0x8   :  { %p1525_p0 = scmp.ne.s32.totalorder %s40_s26, %s1524_s27  ;;  %p1530_p2 = scmp.lt.s32.totalorder %s1524_s27, %s1524_s27 }
   0xa   :  { %p1531_p3 = por %p1530_p2, %p1529_p1 }
   0xc   :  { %p1532_p4 = pnand %p1531_p3, %p1525_p0 }
   0xe   :  { %1535 = shalt.err (!%p1532_p4)
}
   0xf   :  { %s1709_s28 = smov 64   ;;  %s1710_s29 = smov 4  }
  0x10   :  { %45 = dma.hbm_to_vmem [thread:$0]  %s2059_s1, 128, %s40_s26, [#allocation7], %s1709_s28, %s1709_s28, %s1710_s29  }
  0x11   :  { %s1711_s15 = smov [#allocation9]  }
  0x12   :  { %s61_s16 = sshll.u32 %s1711_s15, 4  ;;  %s62_s16 = int_to_ptr.vmem [resolvable:$true] %s61_s16 }
  0x13   :  { %s1544_s17 = scalar_lea.vmem %s62_s16, 512  ;;  %p1549_p6 = scmp.lt.s32.totalorder %s62_s16, %s62_s16 }
  0x14   :  { %p1545_p5 = scmp.ne.s32.totalorder %s62_s16, %s1544_s17  ;;  %p1550_p7 = scmp.lt.s32.totalorder %s1544_s17, %s1544_s17 }
  0x16   :  { %p1551_p8 = por %p1550_p7, %p1549_p6 }
  0x18   :  { %p1552_p9 = pnand %p1551_p8, %p1545_p5 }
  0x1a   :  { %1555 = shalt.err (!%p1552_p9)
}
  0x1b   :  { %s1712_s18 = smov 128   ;;  %s1713_s19 = smov 8  }
  0x1c   :  { %67 = dma.hbm_to_vmem [thread:$0]  %s2061_s3, 512, %s62_s16, [#allocation10], %s1712_s18, %s1712_s18, %s1713_s19  }
  0x1d   :  { %s1714_s22 = smov [#allocation12]   ;;  %s1715_s24 = smov [#allocation3]  }
  0x1e   :  { %s87_s23 = sshll.u32 %s1714_s22, 4  ;;  %s30_s1 = sshll.u32 %s1715_s24, 4  ;;  %s88_s23 = int_to_ptr.vmem [resolvable:$true] %s87_s23  ;;  %s31_s1 = int_to_ptr.vmem [resolvable:$true] %s30_s1 }
  0x1f   :  { %s1564_s25 = scalar_lea.vmem %s88_s23, 256  ;;  %p1569_p11 = scmp.lt.s32.totalorder %s88_s23, %s88_s23 }
  0x20   :  { %p1565_p10 = scmp.ne.s32.totalorder %s88_s23, %s1564_s25  ;;  %p1570_p12 = scmp.lt.s32.totalorder %s1564_s25, %s1564_s25 }
  0x22   :  { %p1571_p13 = por %p1570_p12, %p1569_p11 }
  0x24   :  { %p1572_p0 = pnand %p1571_p13, %p1565_p10 }
  0x26   :  { %1575 = shalt.err (!%p1572_p0)
}
  0x27   :  { %93 = dma.hbm_to_vmem [thread:$0]  %s2065_s7, 256, %s88_s23, [#allocation13], %s1709_s28, %s1709_s28, %s1710_s29  }
  0x28   :  { %s1584_s3 = scalar_lea.vmem %s31_s1, 128  ;;  %p1589_p2 = scmp.lt.s32.totalorder %s31_s1, %s31_s1 }
  0x29   :  { %p1585_p1 = scmp.ne.s32.totalorder %s31_s1, %s1584_s3  ;;  %p1590_p3 = scmp.lt.s32.totalorder %s1584_s3, %s1584_s3 }
  0x2b   :  { %p1591_p4 = por %p1590_p3, %p1589_p2 }
  0x2d   :  { %p1592_p5 = pnand %p1591_p4, %p1585_p1 }
  0x2f   :  { %1595 = shalt.err (!%p1592_p5)
}
  0x30   :  { %33 = dma.hbm_to_vmem [thread:$0]  %s2058_s0, 128, %s31_s1, [#allocation4]  }
  0x31   :  { %s1716_s15 = smov [#allocation8]   ;;  %s1717_s17 = smov [#allocation11]  }
  0x32   :  { %s52_s16 = sshll.u32 %s1716_s15, 4  ;;  %s74_s18 = sshll.u32 %s1717_s17, 4  ;;  %s53_s16 = int_to_ptr.vmem [resolvable:$true] %s52_s16  ;;  %s75_s18 = int_to_ptr.vmem [resolvable:$true] %s74_s18 }
  0x33   :  { %s1604_s19 = scalar_lea.vmem %s53_s16, 16  ;;  %s1608_s7 = scalar_lea.vmem %s53_s16, 32 }
  0x34   :  { %p1605_p6 = scmp.ne.s32.totalorder %s53_s16, %s1604_s19  ;;  %p1609_p7 = scmp.lt.s32.totalorder %s53_s16, %s53_s16 }
  0x35   :  { %p1610_p8 = scmp.lt.s32.totalorder %s1608_s7, %s1604_s19 }
  0x37   :  { %p1611_p9 = por %p1610_p8, %p1609_p7 }
  0x39   :  { %p1612_p10 = pnand %p1611_p9, %p1605_p6 }
  0x3b   :  { %1615 = shalt.err (!%p1612_p10)
}
  0x3c   :  { %55 = dma.hbm_to_vmem [thread:$0]  %s2060_s2, 16, %s53_s16, [#allocation7]  }
  0x3d   :  { %s1624_s22 = scalar_lea.vmem %s75_s18, 32  ;;  %p1629_p12 = scmp.lt.s32.totalorder %s75_s18, %s75_s18 }
  0x3e   :  { %p1625_p11 = scmp.ne.s32.totalorder %s75_s18, %s1624_s22  ;;  %p1630_p13 = scmp.lt.s32.totalorder %s1624_s22, %s1624_s22 }
  0x40   :  { %p1631_p0 = por %p1630_p13, %p1629_p12 }
  0x42   :  { %p1632_p1 = pnand %p1631_p0, %p1625_p11 }
  0x44   :  { %1635 = shalt.err (!%p1632_p1)
}
  0x45   :  { %77 = dma.hbm_to_vmem [thread:$0]  %s2062_s4, 32, %s75_s18, [#allocation10]  }
  0x46   :  { %s1718_s24 = smov [#allocation14]   ;;  %s1719_s25 = smov [#allocation15]  }
  0x47   :  { %s100_s1 = sshll.u32 %s1718_s24, 4  ;;  %s109_s26 = sshll.u32 %s1719_s25, 4  ;;  %s101_s1 = int_to_ptr.vmem [resolvable:$true] %s100_s1  ;;  %s110_s26 = int_to_ptr.vmem [resolvable:$true] %s109_s26 }
  0x48   :  { %s1644_s27 = scalar_lea.vmem %s101_s1, 16  ;;  %s1648_s2 = scalar_lea.vmem %s101_s1, 32 }
  0x49   :  { %p1645_p2 = scmp.ne.s32.totalorder %s101_s1, %s1644_s27  ;;  %p1649_p3 = scmp.lt.s32.totalorder %s101_s1, %s101_s1 }
  0x4a   :  { %p1650_p4 = scmp.lt.s32.totalorder %s1648_s2, %s1644_s27 }
  0x4c   :  { %p1651_p5 = por %p1650_p4, %p1649_p3 }
  0x4e   :  { %p1652_p6 = pnand %p1651_p5, %p1645_p2 }
  0x50   :  { %1655 = shalt.err (!%p1652_p6)
}
  0x51   :  { %103 = dma.hbm_to_vmem [thread:$0]  %s2066_s8, 16, %s101_s1, [#allocation13]  }
  0x52   :  { %s1664_s14 = scalar_lea.vmem %s110_s26, 256  ;;  %p1669_p8 = scmp.lt.s32.totalorder %s110_s26, %s110_s26 }
  0x53   :  { %p1665_p7 = scmp.ne.s32.totalorder %s110_s26, %s1664_s14  ;;  %p1670_p9 = scmp.lt.s32.totalorder %s1664_s14, %s1664_s14 }
  0x55   :  { %p1671_p10 = por %p1670_p9, %p1669_p8 }
  0x57   :  { %p1672_p11 = pnand %p1671_p10, %p1665_p7 }
  0x59   :  { %1675 = shalt.err (!%p1672_p11)
}
  0x5a   :  { %115 = dma.hbm_to_vmem [thread:$0]  %s2067_s9, 256, %s110_s26, [#allocation16], %s1709_s28, %s1709_s28, %s1710_s29  }
  0x5b   :  { %1696 = dma.done.wait [#allocation4], 128  }
  0x5c   :  { %1697 = vsyncadd [#allocation4], 4294967168 }
  0x5d   :  { %1698 = dma.done.wait [#allocation7], 144  }
  0x5e   :  { %1699 = vsyncadd [#allocation7], 4294967152 }
  0x5f   :  { %1700 = dma.done.wait [#allocation10], 544  }
  0x60   :  { %1701 = vsyncadd [#allocation10], 4294966752 }
  0x61   :  { %1702 = dma.done.wait [#allocation13], 272  }
  0x62   :  { %1703 = vsyncadd [#allocation13], 4294967024 }
  0x63   :  { %1704 = dma.done.wait [#allocation16], 256  }
  0x64   :  { %1705 = vsyncadd [#allocation16], 4294967040  ;;  %v1720_v0 = vmov 0.0   ;;  %vm1721_vm0 = vmmov 0   ;;  %v1459_v1 = vld [vmem:[#allocation6] sm:$0xff]   ;;  %v173_v2 = vld [vmem:[#allocation3] sm:$0xff]  ;;  %v166_v23 = vlaneseq }
  0x65   :  { %1331 = vmatprep.subr.bf16.mxu1 %v1720_v0  ;;  %1333 = vmatprep.mubr.msk.bf16.mxu1 %vm1721_vm0, %v1720_v0  ;;  %v174_v3 = vpack.c.bf16 %v173_v2, %v173_v2  ;;  %vm190_vm1 = vcmask 130048   ;;  %v1838_v4 = vld [vmem:[%s2063_s5 + $0x8] sm:$0xff]   ;;  %v1846_v7 = vld [vmem:[%s2063_s5] sm:$0xff]   ;;  %v1722_v10 = vmov 0   ;;  %v1258_v11 = vld [vmem:[#allocation8] ss:$0 sm:$0xff] }
  0x66   :  { %1337 = vmatprep.subr.bf16.mxu0 %v1720_v0  ;;  %1341 = vmatprep.mubr.msk.bf16.mxu0 %vm1721_vm0, %v1720_v0  ;;  %v1461_v5 = vld [vmem:[#allocation9 + $0x10] ss:$8 sps:$4 sm:$0xff]   ;;  %v1463_v6 = vld [vmem:[#allocation9 + $0x14] ss:$8 sps:$4 sm:$0xff]   ;;  %v1467_v8 = vld [vmem:[#allocation9 + $0x4] ss:$8 sps:$4 sm:$0xff]  }
  0x67   :  { %1332 = vmatpush3.bf16.msra.mxu1 %v1459_v1  ;;  %1338 = vmatpush3.bf16.msra.mxu0 %v1838_v4  ;;  %v1465_v9 = vld [vmem:[#allocation9] ss:$8 sps:$4 sm:$0xff]   ;;  %vm272_vm2 = vcmask 261120   ;;  %v1864_v24 = vshrl.u32 %v166_v23, 7  ;;  %v167_v25 = vand.u32 127, %v166_v23  ;;  %v1723_v31 = vmov 0.5  }
  0x68   :  { %288 = vmatprep.subr.bf16.mxu1 %v1463_v6  ;;  %1339 = vmatprep.subr.bf16.mxu0 %v1720_v0  ;;  %v1867_v27 = vld [vmem:[#allocation11] sm:$0x3]  ;;  %s1724_s5 = smov 32   ;;  %s1725_s23 = smov [#allocation17]  }
  0x69   :  { %v244_v26 = vsub.s32 0, %v1864_v24  ;;  %vm168_vm3 = vcmp.ge.s32.totalorder %v167_v25, 64  ;;  %vm169_vm4 = vcmp.lt.s32.totalorder %v167_v25, 96  ;;  %s1244_s24 = sshll.u32 %s1725_s23, 4  ;;  %s1245_s24 = int_to_ptr.vmem [resolvable:$true] %s1244_s24 }
  0x6a   :  { %1334 = vmatmul.mubr.msk.bf16.vlgmr.msra.gmra.mxu1 %vm190_vm1, %v174_v3  ;;  %vm170_vm5 = vmand %vm168_vm3, %vm169_vm4  ;;  %s1676_s1 = scalar_lea.vmem %s1245_s24, 128  ;;  %p1681_p13 = scmp.lt.s32.totalorder %s1245_s24, %s1245_s24 }
  0x6b   :  { %289 = vmatpush1.bf16.msra.mxu1 %v1461_v5  ;;  %1340 = vmatpush3.bf16.msra.mxu0 %v1846_v7  ;;  %v245_v28 = vrot.slane %v1867_v27, %v244_v26  ;;  %v1872_v32 = vsel %vm170_vm5, 1.0, %v1723_v31  ;;  %v1878_v39 = vsel %vm170_vm5, 0.0, %v1723_v31  ;;  %p1677_p12 = scmp.ne.s32.totalorder %s1245_s24, %s1676_s1  ;;  %p1682_p0 = scmp.lt.s32.totalorder %s1676_s1, %s1676_s1 }
  0x6c   :  { %1353 = vmatprep.subr.bf16.mxu0 %v1720_v0  ;;  %290 = vmatprep.subr.bf16.mxu1 %v1467_v8 }
  0x6d   :  { %308 = vmatprep.mubr.bf16.mxu1 %v1722_v10  ;;  %p1683_p1 = por %p1682_p0, %p1681_p13 }
  0x6e   :  { %1342 = vmatmul.mubr.bf16.vlgmr.msra.gmra.mxu0 %v1722_v10 }
  0x6f   :  { %291 = vmatpush1.bf16.msra.mxu1 %v1465_v9  ;;  %1354 = vmatpush3.bf16.msra.mxu0 %v1838_v4  ;;  %p1684_p2 = pnand %p1683_p1, %p1677_p12 }
  0x70   :  { %1345 = vmatprep.subr.bf16.mxu1 %v1720_v0  ;;  %1355 = vmatprep.subr.bf16.mxu0 %v1720_v0 }
  0x71   :  { %1357 = vmatprep.mubr.msk.bf16.mxu0 %vm1721_vm0, %v1720_v0 }
  0x73   :  { %1356 = vmatpush3.bf16.msra.mxu0 %v1846_v7 }
  0x74   :  { %1369 = vmatprep.subr.bf16.mxu0 %v1720_v0 }
 0x12a   :  { %v228_v12 = vpop.f32.mrf.mxu1 }
 0x12b   :  { %v229_v13 = vadd.f32 %v1258_v11, %v228_v12 }
 0x12c   :  { %v1335_v14 = vpop.f32.mrf.mxu1 }
 0x12d   :  { %v234_v15 = vmax.f32 %v229_v13, 0.0 }
 0x12e   :  { %v231_v16 = vpop.f32.mrf.mxu1  ;;  %v366_v19 = vpop.f32.mrf.mxu0 }
 0x12f   :  { %v235_v17 = vpack.c.bf16 %v234_v15, %v234_v15 }
 0x130   :  { %v1336_v18 = vpop.f32.mrf.mxu1  ;;  %v1343_v20 = vpop.f32.mrf.mxu0 }
 0x131   :  { %1265 = vmatmul.mubr.msk.bf16.vlgmr.msra.gmra.mxu1 %vm272_vm2, %v235_v17 }
 0x132   :  { %1346 = vmatpush3.bf16.msra.mxu1 %v1838_v4  ;;  %1349 = vmatprep.mubr.msk.bf16.mxu1 %vm1721_vm0, %v1720_v0  ;;  %v369_v21 = vpop.f32.mrf.mxu0 }
 0x133   :  { %1347 = vmatprep.subr.bf16.mxu1 %v1720_v0 }
 0x134   :  { %v1344_v22 = vpop.f32.mrf.mxu0 }
 0x136   :  { %1348 = vmatpush3.bf16.msra.mxu1 %v1846_v7 }
 0x137   :  { %1361 = vmatprep.subr.bf16.mxu1 %v1720_v0 }
 0x1f1   :  { %v310_v29 = vpop.f32.mrf.mxu1 }
 0x1f2   :  { %v1870_v30 = vadd.f32 %v310_v29, %v245_v28 }
 0x1f3   :  { %v1874_v33 = vpop.f32.mrf.mxu1 }
 0x1f4   :  { %v372_v34 = vadd.f32 %v366_v19, %v1870_v30 }
 0x1f5   :  { %v314_v35 = vpop.f32.mrf.mxu1 }
 0x1f6   :  { %v373_v36 = vmul.f32 %v372_v34, %v1872_v32 }
 0x1f7   :  { %v315_v37 = vpop.f32.mrf.mxu1 }
 0x1f8   :  { %1476 = vtanh.f32 %v373_v36 }
 0x205   :  { %v1477_v38 = vpop.eup %1476 }
 0x206   :  { %v375_v40 = vmul.f32 %v1477_v38, %v1872_v32 }
 0x208   :  { %v376_v41 = vadd.f32 %v375_v40, %v1878_v39 }
 0x20a   :  { %379 = vrot.lane.b32.xlu0 %v376_v41, %s1709_s28  ;;  %v377_v44 = vmul.f32 0.0, %v376_v41 }
 0x27c   :  { %v380_v42 = vpop.permute.xlu0 %379 }
 0x27d   :  { %v382_v43 = vmul.f32 %v380_v42, %v376_v41 }
 0x27f   :  { %384 = vrot.lane.b32.xlu0 %v382_v43, %s1724_s5 }
 0x2f1   :  { %v385_v45 = vpop.permute.xlu0 %384 }
 0x2f2   :  { %v387_v46 = vadd.f32 %v385_v45, %v377_v44 }
 0x2f4   :  { %1478 = vtanh.f32 %v387_v46 }
 0x301   :  { %v1479_v47 = vpop.eup %1478 }
 0x302   :  { %390 = vrot.lane.b32.xlu1 %v1479_v47, %s1709_s28 }
 0x374   :  { %v391_v48 = vpop.permute.xlu1 %390 }
 0x375   :  { %v393_v49 = vmul.f32 %v391_v48, %v376_v41 }
 0x377   :  { %v394_v50 = vpack.c.bf16 %v393_v49, %v393_v49 }
 0x379   :  { %396 = vrot.lane.b32.xlu1 %v394_v50, %s1724_s5 }
 0x3eb   :  { %v397_v51 = vpop.permute.xlu1 %396 }
 0x3ec   :  { %1350 = vmatmul.mubr.msk.bf16.vlgmr.msra.gmra.mxu1 %vm272_vm2, %v397_v51 }
 0x3ed   :  { %1362 = vmatpush3.bf16.msra.mxu1 %v1838_v4  ;;  %1365 = vmatprep.mubr.msk.bf16.mxu1 %vm1721_vm0, %v1720_v0 }
 0x3ee   :  { %1363 = vmatprep.subr.bf16.mxu1 %v1720_v0 }
 0x3f1   :  { %1364 = vmatpush3.bf16.msra.mxu1 %v1846_v7 }
 0x3f2   :  { %1377 = vmatprep.subr.bf16.mxu1 %v1720_v0 }
 0x4ac   :  { %v435_v52 = vpop.f32.mrf.mxu1 }
 0x4ad   :  { %v441_v53 = vadd.f32 %v435_v52, %v1870_v30 }
 0x4ae   :  { %v1351_v54 = vpop.f32.mrf.mxu1 }
 0x4af   :  { %v442_v55 = vmul.f32 %v441_v53, %v1872_v32 }
 0x4b0   :  { %v438_v56 = vpop.f32.mrf.mxu1 }
 0x4b1   :  { %1480 = vtanh.f32 %v442_v55 }
 0x4b2   :  { %v1352_v57 = vpop.f32.mrf.mxu1 }
 0x4be   :  { %v1481_v58 = vpop.eup %1480 }
 0x4bf   :  { %v444_v59 = vmul.f32 %v1481_v58, %v1872_v32 }
 0x4c1   :  { %v445_v60 = vadd.f32 %v444_v59, %v1878_v39 }
 0x4c3   :  { %448 = vrot.lane.b32.xlu0 %v445_v60, %s1709_s28  ;;  %v446_v63 = vmul.f32 %v445_v60, %v387_v46 }
 0x535   :  { %v449_v61 = vpop.permute.xlu0 %448 }
 0x536   :  { %v451_v62 = vmul.f32 %v449_v61, %v445_v60 }
 0x538   :  { %453 = vrot.lane.b32.xlu1 %v451_v62, %s1724_s5 }
 0x5aa   :  { %v454_v1 = vpop.permute.xlu1 %453 }
 0x5ab   :  { %v456_v2 = vadd.f32 %v454_v1, %v446_v63 }
 0x5ad   :  { %1482 = vtanh.f32 %v456_v2 }
 0x5ba   :  { %v1483_v3 = vpop.eup %1482 }
 0x5bb   :  { %459 = vrot.lane.b32.xlu0 %v1483_v3, %s1709_s28  ;;  %v1469_v3 = vld [vmem:[%s2064_s6] sm:$0xff]  }
 0x62d   :  { %v460_v5 = vpop.permute.xlu0 %459 }
 0x62e   :  { %v462_v6 = vmul.f32 %v460_v5, %v445_v60 }
 0x630   :  { %v463_v8 = vpack.c.bf16 %v462_v6, %v462_v6 }
 0x632   :  { %465 = vrot.lane.b32.xlu1 %v463_v8, %s1724_s5 }
 0x6a4   :  { %v466_v9 = vpop.permute.xlu1 %465 }
 0x6a5   :  { %1358 = vmatmul.mubr.msk.bf16.vlgmr.msra.gmra.mxu0 %vm272_vm2, %v466_v9 }
 0x6a6   :  { %1370 = vmatpush3.bf16.msra.mxu0 %v1838_v4  ;;  %1373 = vmatprep.mubr.msk.bf16.mxu0 %vm1721_vm0, %v1720_v0 }
 0x6a7   :  { %1371 = vmatprep.subr.bf16.mxu0 %v1720_v0 }
 0x6aa   :  { %1372 = vmatpush3.bf16.msra.mxu0 %v1846_v7 }
 0x6ab   :  { %1385 = vmatprep.subr.bf16.mxu0 %v1720_v0 }
 0x765   :  { %v504_v10 = vpop.f32.mrf.mxu0 }
 0x766   :  { %v510_v11 = vadd.f32 %v504_v10, %v1870_v30 }
 0x767   :  { %v1359_v12 = vpop.f32.mrf.mxu0 }
 0x768   :  { %v511_v13 = vmul.f32 %v510_v11, %v1872_v32  ;;  %v248_v11 = vsub.s32 1, %v1864_v24 }
 0x769   :  { %v507_v14 = vpop.f32.mrf.mxu0 }
 0x76a   :  { %1484 = vtanh.f32 %v511_v13  ;;  %v249_v12 = vrot.slane %v1867_v27, %v248_v11 }
 0x76b   :  { %v1360_v15 = vpop.f32.mrf.mxu0 }
 0x76c   :  { %v313_v13 = vadd.f32 %v1874_v33, %v249_v12 }
 0x777   :  { %v1485_v16 = vpop.eup %1484 }
 0x778   :  { %v513_v4 = vmul.f32 %v1485_v16, %v1872_v32 }
 0x77a   :  { %v514_v17 = vadd.f32 %v513_v4, %v1878_v39 }
 0x77c   :  { %517 = vrot.lane.b32.xlu0 %v514_v17, %s1709_s28  ;;  %v515_v19 = vmul.f32 %v514_v17, %v456_v2  ;;  %v1468_v2 = vld [vmem:[%s2064_s6 + $0x8] sm:$0xff]  }
 0x7ee   :  { %v518_v18 = vpop.permute.xlu0 %517 }
 0x7ef   :  { %v520_v7 = vmul.f32 %v518_v18, %v514_v17 }
 0x7f1   :  { %522 = vrot.lane.b32.xlu1 %v520_v7, %s1724_s5 }
 0x863   :  { %v523_v20 = vpop.permute.xlu1 %522 }
 0x864   :  { %v525_v21 = vadd.f32 %v523_v20, %v515_v19 }
 0x866   :  { %1486 = vtanh.f32 %v525_v21 }
 0x873   :  { %v1487_v22 = vpop.eup %1486 }
 0x874   :  { %528 = vrot.lane.b32.xlu0 %v1487_v22, %s1709_s28 }
 0x8e6   :  { %v529_v23 = vpop.permute.xlu0 %528 }
 0x8e7   :  { %v531_v25 = vmul.f32 %v529_v23, %v514_v17  ;;  %v1470_v23 = vld [vmem:[#allocation12 + $0x8] sm:$0xff]  }
 0x8e9   :  { %v532_v26 = vpack.c.bf16 %v531_v25, %v531_v25  ;;  %v1471_v25 = vld [vmem:[#allocation12] sm:$0xff]  }
 0x8eb   :  { %534 = vrot.lane.b32.xlu1 %v532_v26, %s1724_s5 }
 0x95d   :  { %v535_v28 = vpop.permute.xlu1 %534 }
 0x95e   :  { %1366 = vmatmul.mubr.msk.bf16.vlgmr.msra.gmra.mxu1 %vm272_vm2, %v535_v28 }
 0x95f   :  { %1381 = vmatprep.mubr.msk.bf16.mxu1 %vm1721_vm0, %v1720_v0  ;;  %1378 = vmatpush3.bf16.msra.mxu1 %v1468_v2 }
 0x960   :  { %1379 = vmatprep.subr.bf16.mxu1 %v1720_v0 }
 0x963   :  { %1380 = vmatpush3.bf16.msra.mxu1 %v1469_v3 }
 0x964   :  { %1393 = vmatprep.subr.bf16.mxu1 %v1720_v0 }
 0xa1e   :  { %v573_v29 = vpop.f32.mrf.mxu1 }
 0xa1f   :  { %v579_v31 = vadd.f32 %v573_v29, %v1870_v30 }
 0xa20   :  { %v1367_v34 = vpop.f32.mrf.mxu1 }
 0xa21   :  { %v580_v35 = vmul.f32 %v579_v31, %v1872_v32 }
 0xa22   :  { %v576_v36 = vpop.f32.mrf.mxu1 }
 0xa23   :  { %1488 = vtanh.f32 %v580_v35  ;;  %v1972_v35 = vld [vmem:[#allocation14] ss:$0 sm:$0xff] }
 0xa24   :  { %v1368_v37 = vpop.f32.mrf.mxu1 }
 0xa30   :  { %v1489_v38 = vpop.eup %1488 }
 0xa31   :  { %v582_v40 = vmul.f32 %v1489_v38, %v1872_v32 }
 0xa33   :  { %v583_v41 = vadd.f32 %v582_v40, %v1878_v39 }
 0xa35   :  { %586 = vrot.lane.b32.xlu0 %v583_v41, %s1709_s28  ;;  %v584_v44 = vmul.f32 %v583_v41, %v525_v21 }
 0xaa7   :  { %v587_v42 = vpop.permute.xlu0 %586 }
 0xaa8   :  { %v589_v43 = vmul.f32 %v587_v42, %v583_v41 }
 0xaaa   :  { %591 = vrot.lane.b32.xlu1 %v589_v43, %s1724_s5 }
 0xb1c   :  { %v592_v45 = vpop.permute.xlu1 %591 }
 0xb1d   :  { %v594_v46 = vadd.f32 %v592_v45, %v584_v44 }
 0xb1f   :  { %1490 = vtanh.f32 %v594_v46 }
 0xb2c   :  { %v1491_v47 = vpop.eup %1490 }
 0xb2d   :  { %597 = vrot.lane.b32.xlu0 %v1491_v47, %s1709_s28 }
 0xb9f   :  { %v598_v48 = vpop.permute.xlu0 %597 }
 0xba0   :  { %v600_v49 = vmul.f32 %v598_v48, %v583_v41 }
 0xba2   :  { %v601_v50 = vpack.c.bf16 %v600_v49, %v600_v49 }
 0xba4   :  { %603 = vrot.lane.b32.xlu1 %v601_v50, %s1724_s5 }
 0xc16   :  { %v604_v51 = vpop.permute.xlu1 %603 }
 0xc17   :  { %1374 = vmatmul.mubr.msk.bf16.vlgmr.msra.gmra.mxu0 %vm272_vm2, %v604_v51 }
 0xc18   :  { %1389 = vmatprep.mubr.msk.bf16.mxu0 %vm1721_vm0, %v1720_v0  ;;  %1386 = vmatpush3.bf16.msra.mxu0 %v1470_v23 }
 0xc19   :  { %1387 = vmatprep.subr.bf16.mxu0 %v1720_v0 }
 0xc1c   :  { %1388 = vmatpush3.bf16.msra.mxu0 %v1471_v25 }
 0xc1d   :  { %1401 = vmatprep.subr.bf16.mxu0 %v1720_v0 }
 0xcd7   :  { %v642_v52 = vpop.f32.mrf.mxu0 }
 0xcd8   :  { %v648_v53 = vadd.f32 %v642_v52, %v1870_v30 }
 0xcd9   :  { %v1375_v54 = vpop.f32.mrf.mxu0 }
 0xcda   :  { %v649_v55 = vmul.f32 %v648_v53, %v1872_v32 }
 0xcdb   :  { %v645_v56 = vpop.f32.mrf.mxu0 }
 0xcdc   :  { %1492 = vtanh.f32 %v649_v55 }
 0xcdd   :  { %v1376_v57 = vpop.f32.mrf.mxu0 }
 0xce9   :  { %v1493_v58 = vpop.eup %1492 }
 0xcea   :  { %v651_v59 = vmul.f32 %v1493_v58, %v1872_v32 }
 0xcec   :  { %v652_v60 = vadd.f32 %v651_v59, %v1878_v39 }
 0xcee   :  { %655 = vrot.lane.b32.xlu0 %v652_v60, %s1709_s28  ;;  %v653_v63 = vmul.f32 %v652_v60, %v594_v46 }
 0xd60   :  { %v656_v61 = vpop.permute.xlu0 %655 }
 0xd61   :  { %v658_v62 = vmul.f32 %v656_v61, %v652_v60 }
 0xd63   :  { %660 = vrot.lane.b32.xlu1 %v658_v62, %s1724_s5 }
 0xdd5   :  { %v661_v1 = vpop.permute.xlu1 %660 }
 0xdd6   :  { %v663_v30 = vadd.f32 %v661_v1, %v653_v63 }
 0xdd8   :  { %1494 = vtanh.f32 %v663_v30 }
 0xde5   :  { %v1495_v5 = vpop.eup %1494 }
 0xde6   :  { %666 = vrot.lane.b32.xlu0 %v1495_v5, %s1709_s28 }
 0xe58   :  { %v667_v6 = vpop.permute.xlu0 %666 }
 0xe59   :  { %v669_v8 = vmul.f32 %v667_v6, %v652_v60 }
 0xe5b   :  { %v670_v9 = vpack.c.bf16 %v669_v8, %v669_v8 }
 0xe5d   :  { %672 = vrot.lane.b32.xlu1 %v670_v9, %s1724_s5 }
 0xecf   :  { %v673_v10 = vpop.permute.xlu1 %672 }
 0xed0   :  { %1382 = vmatmul.mubr.msk.bf16.vlgmr.msra.gmra.mxu1 %vm272_vm2, %v673_v10 }
 0xed1   :  { %1397 = vmatprep.mubr.msk.bf16.mxu1 %vm1721_vm0, %v1720_v0  ;;  %1394 = vmatpush3.bf16.msra.mxu1 %v1470_v23 }
 0xed2   :  { %1395 = vmatprep.subr.bf16.mxu1 %v1720_v0 }
 0xed5   :  { %1396 = vmatpush3.bf16.msra.mxu1 %v1471_v25 }
 0xed6   :  { %1409 = vmatprep.subr.bf16.mxu1 %v1720_v0 }
 0xf90   :  { %v723_v14 = vpop.f32.mrf.mxu1 }
 0xf91   :  { %v729_v15 = vadd.f32 %v723_v14, %v313_v13 }
 0xf92   :  { %v1383_v16 = vpop.f32.mrf.mxu1 }
 0xf93   :  { %v730_v4 = vmul.f32 %v729_v15, %v1872_v32 }
 0xf94   :  { %v726_v17 = vpop.f32.mrf.mxu1 }
 0xf95   :  { %1496 = vtanh.f32 %v730_v4 }
 0xf96   :  { %v1384_v18 = vpop.f32.mrf.mxu1 }
 0xfa2   :  { %v1497_v7 = vpop.eup %1496 }
 0xfa3   :  { %v732_v19 = vmul.f32 %v1497_v7, %v1872_v32 }
 0xfa5   :  { %v733_v20 = vadd.f32 %v732_v19, %v1878_v39 }
 0xfa7   :  { %736 = vrot.lane.b32.xlu0 %v733_v20, %s1709_s28  ;;  %v734_v27 = vmul.f32 %v733_v20, %v663_v30 }
0x1019   :  { %v737_v24 = vpop.permute.xlu0 %736 }
0x101a   :  { %v739_v21 = vmul.f32 %v737_v24, %v733_v20 }
0x101c   :  { %741 = vrot.lane.b32.xlu1 %v739_v21, %s1724_s5 }
0x108e   :  { %v742_v33 = vpop.permute.xlu1 %741 }
0x108f   :  { %v744_v22 = vadd.f32 %v742_v33, %v734_v27 }
0x1091   :  { %1498 = vtanh.f32 %v744_v22 }
0x109e   :  { %v1499_v26 = vpop.eup %1498 }
0x109f   :  { %747 = vrot.lane.b32.xlu0 %v1499_v26, %s1709_s28 }
0x1111   :  { %v748_v28 = vpop.permute.xlu0 %747 }
0x1112   :  { %v1962_v29 = vmul.f32 %v748_v28, %v733_v20 }
0x1114   :  { %v756_v31 = vpack.c.bf16 %v1962_v29, %v1962_v29 }
0x1116   :  { %758 = vrot.lane.b32.xlu1 %v756_v31, %s1724_s5 }
0x1188   :  { %v759_v34 = vpop.permute.xlu1 %758 }
0x1189   :  { %1390 = vmatmul.mubr.msk.bf16.vlgmr.msra.gmra.mxu0 %vm272_vm2, %v759_v34 }
0x118a   :  { %1402 = vmatpush3.bf16.msra.mxu0 %v1470_v23  ;;  %1405 = vmatprep.mubr.msk.bf16.mxu0 %vm1721_vm0, %v1720_v0 }
0x118b   :  { %1403 = vmatprep.subr.bf16.mxu0 %v1720_v0 }
0x118e   :  { %1404 = vmatpush3.bf16.msra.mxu0 %v1471_v25 }
0x118f   :  { %1417 = vmatprep.subr.bf16.mxu0 %v1720_v0 }
0x1249   :  { %v809_v36 = vpop.f32.mrf.mxu0 }
0x124a   :  { %v815_v37 = vadd.f32 %v1972_v35, %v809_v36 }
0x124b   :  { %v1391_v38 = vpop.f32.mrf.mxu0 }
0x124c   :  { %v816_v40 = vmul.f32 %v815_v37, %v1872_v32 }
0x124d   :  { %v812_v41 = vpop.f32.mrf.mxu0 }
0x124e   :  { %1500 = vtanh.f32 %v816_v40 }
0x124f   :  { %v1392_v42 = vpop.f32.mrf.mxu0 }
0x125b   :  { %v1501_v43 = vpop.eup %1500 }
0x125c   :  { %v818_v44 = vmul.f32 %v1501_v43, %v1872_v32 }
0x125e   :  { %v819_v45 = vadd.f32 %v818_v44, %v1878_v39 }
0x1260   :  { %822 = vrot.lane.b32.xlu0 %v819_v45, %s1709_s28  ;;  %v820_v48 = vmul.f32 %v819_v45, %v744_v22 }
0x12d2   :  { %v823_v46 = vpop.permute.xlu0 %822 }
0x12d3   :  { %v825_v47 = vmul.f32 %v823_v46, %v819_v45 }
0x12d5   :  { %827 = vrot.lane.b32.xlu1 %v825_v47, %s1724_s5 }
0x1347   :  { %v828_v49 = vpop.permute.xlu1 %827 }
0x1348   :  { %v830_v50 = vadd.f32 %v828_v49, %v820_v48  ;;  %v1473_v49 = vld [vmem:[#allocation15] sm:$0xff]  }
0x134a   :  { %1502 = vtanh.f32 %v830_v50 }
0x1357   :  { %v1503_v51 = vpop.eup %1502 }
0x1358   :  { %833 = vrot.lane.b32.xlu0 %v1503_v51, %s1709_s28 }
0x13ca   :  { %v834_v52 = vpop.permute.xlu0 %833 }
0x13cb   :  { %v1981_v53 = vmul.f32 %v834_v52, %v819_v45 }
0x13cd   :  { %v842_v54 = vpack.c.bf16 %v1981_v53, %v1981_v53 }
0x13cf   :  { %844 = vrot.lane.b32.xlu1 %v842_v54, %s1724_s5 }
0x1441   :  { %v845_v55 = vpop.permute.xlu1 %844 }
0x1442   :  { %1398 = vmatmul.mubr.msk.bf16.vlgmr.msra.gmra.mxu1 %vm272_vm2, %v845_v55 }
0x1443   :  { %1410 = vmatpush3.bf16.msra.mxu1 %v1470_v23  ;;  %1413 = vmatprep.mubr.msk.bf16.mxu1 %vm1721_vm0, %v1720_v0 }
0x1444   :  { %1411 = vmatprep.subr.bf16.mxu1 %v1720_v0 }
0x1447   :  { %1412 = vmatpush3.bf16.msra.mxu1 %v1471_v25 }
0x1448   :  { %1433 = vmatprep.subr.bf16.mxu1 %v1720_v0 }
0x1502   :  { %v883_v56 = vpop.f32.mrf.mxu1 }
0x1503   :  { %v889_v57 = vadd.f32 %v1972_v35, %v883_v56 }
0x1504   :  { %v1399_v58 = vpop.f32.mrf.mxu1 }
0x1505   :  { %v890_v59 = vmul.f32 %v889_v57, %v1872_v32 }
0x1506   :  { %v886_v60 = vpop.f32.mrf.mxu1 }
0x1507   :  { %1504 = vtanh.f32 %v890_v59 }
0x1508   :  { %v1400_v61 = vpop.f32.mrf.mxu1 }
0x1514   :  { %v1505_v62 = vpop.eup %1504 }
0x1515   :  { %v892_v63 = vmul.f32 %v1505_v62, %v1872_v32 }
0x1517   :  { %v893_v1 = vadd.f32 %v892_v63, %v1878_v39  ;;  %v1474_v63 = vld [vmem:[%s2069_s11 + $0x8] sm:$0xff]  }
0x1519   :  { %896 = vrot.lane.b32.xlu0 %v893_v1, %s1709_s28  ;;  %v894_v3 = vmul.f32 %v893_v1, %v830_v50 }
0x158b   :  { %v897_v30 = vpop.permute.xlu0 %896 }
0x158c   :  { %v899_v2 = vmul.f32 %v897_v30, %v893_v1  ;;  %v1281_v30 = vld [vmem:[%s2068_s10] ss:$0 sm:$0xff] }
0x158e   :  { %901 = vrot.lane.b32.xlu1 %v899_v2, %s1724_s5 }
0x1600   :  { %v902_v5 = vpop.permute.xlu1 %901 }
0x1601   :  { %v904_v6 = vadd.f32 %v902_v5, %v894_v3 }
0x1603   :  { %1506 = vtanh.f32 %v904_v6 }
0x1610   :  { %v1507_v8 = vpop.eup %1506 }
0x1611   :  { %907 = vrot.lane.b32.xlu0 %v1507_v8, %s1709_s28 }
0x1683   :  { %v908_v9 = vpop.permute.xlu0 %907 }
0x1684   :  { %v910_v10 = vmul.f32 %v908_v9, %v893_v1  ;;  %v1475_v1 = vld [vmem:[%s2069_s11] sm:$0xff]  }
0x1686   :  { %v916_v11 = vpack.c.bf16 %v910_v10, %v910_v10 }
0x1688   :  { %918 = vrot.lane.b32.xlu1 %v916_v11, %s1724_s5 }
0x16fa   :  { %v919_v12 = vpop.permute.xlu1 %918 }
0x16fb   :  { %1406 = vmatmul.mubr.msk.bf16.vlgmr.msra.gmra.mxu0 %vm272_vm2, %v919_v12 }
0x16fc   :  { %1421 = vmatprep.mubr.msk.bf16.mxu0 %vm1721_vm0, %v1720_v0 }
0x17bb   :  { %v957_v13 = vpop.f32.mrf.mxu0 }
0x17bc   :  { %v963_v14 = vadd.f32 %v1972_v35, %v957_v13 }
0x17bd   :  { %v1407_v15 = vpop.f32.mrf.mxu0 }
0x17be   :  { %v964_v16 = vmul.f32 %v963_v14, %v1872_v32 }
0x17bf   :  { %v960_v4 = vpop.f32.mrf.mxu0 }
0x17c0   :  { %1508 = vtanh.f32 %v964_v16 }
0x17c1   :  { %v1408_v17 = vpop.f32.mrf.mxu0 }
0x17cd   :  { %v1509_v18 = vpop.eup %1508 }
0x17ce   :  { %v966_v7 = vmul.f32 %v1509_v18, %v1872_v32 }
0x17d0   :  { %v967_v19 = vadd.f32 %v966_v7, %v1878_v39 }
0x17d2   :  { %970 = vrot.lane.b32.xlu0 %v967_v19, %s1709_s28  ;;  %v968_v21 = vmul.f32 %v967_v19, %v904_v6 }
0x1844   :  { %v971_v20 = vpop.permute.xlu0 %970 }
0x1845   :  { %v973_v24 = vmul.f32 %v971_v20, %v967_v19 }
0x1847   :  { %975 = vrot.lane.b32.xlu1 %v973_v24, %s1724_s5 }
0x18b9   :  { %v976_v27 = vpop.permute.xlu1 %975 }
0x18ba   :  { %v978_v33 = vadd.f32 %v976_v27, %v968_v21 }
0x18bc   :  { %1510 = vtanh.f32 %v978_v33 }
0x18c9   :  { %v1511_v22 = vpop.eup %1510 }
0x18ca   :  { %981 = vrot.lane.b32.xlu0 %v1511_v22, %s1709_s28 }
0x193c   :  { %v982_v23 = vpop.permute.xlu0 %981 }
0x193d   :  { %v984_v25 = vmul.f32 %v982_v23, %v967_v19 }
0x193f   :  { %v990_v26 = vpack.c.bf16 %v984_v25, %v984_v25 }
0x1941   :  { %992 = vrot.lane.b32.xlu1 %v990_v26, %s1724_s5 }
0x19b3   :  { %v993_v28 = vpop.permute.xlu1 %992 }
0x19b4   :  { %1414 = vmatmul.mubr.msk.bf16.vlgmr.msra.gmra.mxu1 %vm272_vm2, %v993_v28  ;;  %v1287_v28 = vld [vmem:[%s2070_s12] ss:$0 sm:$0xff] }
0x19b5   :  { %1437 = vmatprep.mubr.msk.bf16.mxu1 %vm1721_vm0, %v1720_v0  ;;  %1434 = vmatpush3.bf16.msra.mxu1 %v1474_v63 }
0x19b6   :  { %1435 = vmatprep.subr.bf16.mxu1 %v1720_v0 }
0x19b9   :  { %1436 = vmatpush3.bf16.msra.mxu1 %v1475_v1 }
0x1a74   :  { %v1031_v31 = vpop.f32.mrf.mxu1 }
0x1a75   :  { %v1037_v34 = vadd.f32 %v1972_v35, %v1031_v31 }
0x1a76   :  { %v1415_v36 = vpop.f32.mrf.mxu1 }
0x1a77   :  { %v1038_v37 = vmul.f32 %v1037_v34, %v1872_v32 }
0x1a78   :  { %v1034_v38 = vpop.f32.mrf.mxu1 }
0x1a79   :  { %1512 = vtanh.f32 %v1038_v37 }
0x1a7a   :  { %v1416_v40 = vpop.f32.mrf.mxu1 }
0x1a86   :  { %v1513_v41 = vpop.eup %1512 }
0x1a87   :  { %v1040_v42 = vmul.f32 %v1513_v41, %v1872_v32 }
0x1a89   :  { %v1041_v43 = vadd.f32 %v1040_v42, %v1878_v39  ;;  %v1472_v39 = vld [vmem:[#allocation15 + $0x8] sm:$0xff]  }
0x1a8a   :  { %1418 = vmatpush3.bf16.msra.mxu0 %v1472_v39 }
0x1a8b   :  { %1044 = vrot.lane.b32.xlu0 %v1041_v43, %s1709_s28  ;;  %v1042_v35 = vmul.f32 %v1041_v43, %v978_v33  ;;  %1419 = vmatprep.subr.bf16.mxu0 %v1720_v0 }
0x1a8e   :  { %1420 = vmatpush3.bf16.msra.mxu0 %v1473_v49 }
0x1afd   :  { %v1045_v44 = vpop.permute.xlu0 %1044 }
0x1afe   :  { %v1047_v45 = vmul.f32 %v1045_v44, %v1041_v43 }
0x1b00   :  { %1049 = vrot.lane.b32.xlu1 %v1047_v45, %s1724_s5 }
0x1b04   :  { %752 = vrot.lane.b32.xlu1 %v1962_v29, %s1724_s5 }
0x1b08   :  { %912 = vrot.lane.b32.xlu1 %v910_v10, %s1724_s5 }
0x1b72   :  { %v1050_v46 = vpop.permute.xlu1 %1049 }
0x1b73   :  { %v1052_v47 = vadd.f32 %v1050_v46, %v1042_v35 }
0x1b75   :  { %1514 = vtanh.f32 %v1052_v47 }
0x1b76   :  { %v753_v48 = vpop.permute.xlu1 %752 }
0x1b77   :  { %755 = vst.msk [vmem:[#allocation2] sm:$0xff] %vm272_vm2, %v753_v48 }
0x1b7a   :  { %v913_v32 = vpop.permute.xlu1 %912 }
0x1b7b   :  { %915 = vst.msk [vmem:[#allocation2 + $0x10] sm:$0xff] %vm272_vm2, %v913_v32 }
0x1b7e   :  { %v1064_v55 = vld [vmem:[#allocation2] sm:$0xff] }
0x1b82   :  { %v1515_v50 = vpop.eup %1514  ;;  %v1066_v58 = vld [vmem:[#allocation2 + $0x10] sm:$0xff] }
0x1b83   :  { %1055 = vrot.lane.b32.xlu0 %v1515_v50, %s1709_s28 }
0x1b87   :  { %838 = vrot.lane.b32.xlu0 %v1981_v53, %s1724_s5 }
0x1b8b   :  { %986 = vrot.lane.b32.xlu0 %v984_v25, %s1724_s5 }
0x1bf5   :  { %v1056_v29 = vpop.permute.xlu0 %1055 }
0x1bf6   :  { %v1058_v51 = vmul.f32 %v1056_v29, %v1041_v43 }
0x1bf8   :  { %1060 = vrot.lane.b32.xlu1 %v1058_v51, %s1724_s5 }
0x1bf9   :  { %v839_v52 = vpop.permute.xlu0 %838 }
0x1bfa   :  { %841 = vst.msk [vmem:[#allocation2 + $0x8] sm:$0xff] %vm272_vm2, %v839_v52 }
0x1bfd   :  { %v987_v54 = vpop.permute.xlu0 %986 }
0x1bfe   :  { %989 = vst.msk [vmem:[#allocation2 + $0x18] sm:$0xff] %vm272_vm2, %v987_v54 }
0x1c01   :  { %v1065_v56 = vld [vmem:[#allocation2 + $0x8] sm:$0xff] }
0x1c02   :  { %v1069_v57 = vpack.c.bf16 %v1065_v56, %v1064_v55 }
0x1c04   :  { %1422 = vmatmul.mubr.msk.bf16.vlgmr.msra.gmra.mxu0 %vm272_vm2, %v1069_v57 }
0x1c05   :  { %1425 = vmatprep.mubr.msk.bf16.mxu0 %vm1721_vm0, %v1720_v0  ;;  %v1067_v53 = vld [vmem:[#allocation2 + $0x18] sm:$0xff] }
0x1c06   :  { %v1070_v59 = vpack.c.bf16 %v1067_v53, %v1066_v58 }
0x1c0c   :  { %1426 = vmatmul.mubr.msk.bf16.gmra.mxu0 %vm272_vm2, %v1070_v59 }
0x1c0d   :  { %1429 = vmatprep.mubr.msk.bf16.mxu0 %vm1721_vm0, %v1720_v0 }
0x1c6a   :  { %v1061_v60 = vpop.permute.xlu1 %1060 }
0x1c6b   :  { %1063 = vst.msk [vmem:[#allocation2 + $0x20] sm:$0xff] %vm272_vm2, %v1061_v60 }
0x1c72   :  { %v1068_v61 = vld [vmem:[#allocation2 + $0x20] sm:$0xff] }
0x1c73   :  { %v1071_v62 = vpack.c.bf16 %v1068_v61, %v1068_v61 }
0x1c75   :  { %1430 = vmatmul.mubr.msk.bf16.gmra.mxu0 %vm272_vm2, %v1071_v62 }
0x1cc4   :  { %v1138_v2 = vpop.f32.mrf.mxu0 }
0x1cc5   :  { %v1139_v5 = vadd.f32 %v1281_v30, %v1138_v2 }
0x1cc6   :  { %v1423_v3 = vpop.f32.mrf.mxu0 }
0x1cc7   :  { %v1160_v10 = vmax.f32 %v1139_v5, 0.0 }
0x1cc8   :  { %v1141_v6 = vpop.f32.mrf.mxu0 }
0x1cc9   :  { %v1142_v8 = vadd.f32 %v1281_v30, %v1141_v6 }
0x1cca   :  { %v1424_v9 = vpop.f32.mrf.mxu0 }
0x1ccb   :  { %v1161_v11 = vmax.f32 %v1142_v8, 0.0 }
0x1ccc   :  { %v1146_v12 = vpop.f32.mrf.mxu0 }
0x1ccd   :  { %v1165_v13 = vadd.f32 %v1161_v11, %v1160_v10  ;;  %v1147_v0 = vadd.f32 %v1281_v30, %v1146_v12 }
0x1cce   :  { %v1427_v14 = vpop.f32.mrf.mxu0 }
0x1ccf   :  { %v1162_v15 = vmax.f32 %v1147_v0, 0.0 }
0x1cd0   :  { %v1149_v16 = vpop.f32.mrf.mxu0 }
0x1cd1   :  { %v1166_v4 = vadd.f32 %v1165_v13, %v1162_v15  ;;  %v1150_v17 = vadd.f32 %v1281_v30, %v1149_v16 }
0x1cd2   :  { %v1428_v18 = vpop.f32.mrf.mxu0 }
0x1cd3   :  { %v1163_v7 = vmax.f32 %v1150_v17, 0.0 }
0x1cd5   :  { %v1167_v19 = vadd.f32 %v1166_v4, %v1163_v7 }
0x1d35   :  { %v1154_v20 = vpop.f32.mrf.mxu0 }
0x1d36   :  { %v1155_v24 = vadd.f32 %v1281_v30, %v1154_v20 }
0x1d37   :  { %v1431_v21 = vpop.f32.mrf.mxu0 }
0x1d38   :  { %v1164_v27 = vmax.f32 %v1155_v24, 0.0 }
0x1d39   :  { %v1157_v33 = vpop.f32.mrf.mxu0 }
0x1d3a   :  { %v1168_v22 = vadd.f32 %v1167_v19, %v1164_v27 }
0x1d3b   :  { %v1432_v23 = vpop.f32.mrf.mxu0 }
0x1d3c   :  { %v1169_v25 = vmul.f32 0.2, %v1168_v22 }
0x1d3e   :  { %v1170_v26 = vpack.c.bf16 %v1169_v25, %v1169_v25 }
0x1d40   :  { %1438 = vmatmul.mubr.msk.bf16.vlgmr.msra.gmra.mxu1 %vm272_vm2, %v1170_v26 }
0x1e00   :  { %v1231_v31 = vpop.f32.mrf.mxu1 }
0x1e01   :  { %v1232_v34 = vadd.f32 %v1287_v28, %v1231_v31 }
0x1e02   :  { %v1439_v36 = vpop.f32.mrf.mxu1 }
0x1e03   :  { %1237 = vst.msk [vmem:[#allocation17] sm:$0xff] %vm190_vm1, %v1232_v34 }
0x1e04   :  { %v1234_v37 = vpop.f32.mrf.mxu1 }
0x1e05   :  { %1687 = shalt.err (!%p1684_p2)
}
0x1e06   :  { %1247 = dma.vmem_to_hbm [thread:$0]  %s1245_s24, 128, %s2071_s13, [#allocation5]   ;;  %v1440_v38 = vpop.f32.mrf.mxu1 }
0x1e07   :  { %1706 = dma.done.wait [#allocation5], 128  }
0x1e08   :  { %1707 = vsyncadd [#allocation5], 4294967168 }
0x1e09   :  { %1251 = vsyncpa [#allocation4], 1 }
0x1e0a   :  { %1252 = vsyncpa [#allocation7], 1 }
0x1e0b   :  { %1253 = vsyncpa [#allocation10], 1 }
0x1e0c   :  { %1254 = vsyncpa [#allocation13], 1 }
0x1e0d   :  { %1255 = vsyncpa [#allocation16], 1 }
0x1e0e   :  { %1256 = vsyncpa [#allocation5], 1 }

</bundles_post_ra>
